<compile_context>
chip_gen: v5e
topology: v5e:2x2
jax: 0.10.0
libtpu: 0.0.40
codegen_flags: <defaults>
</compile_context>

<pallas_src>
import functools

import jax
import jax.numpy as jnp
from jax.experimental import pallas as pl
from jax.experimental.pallas import tpu as pltpu


# ----------------------------------------------------------------------------
# Kernel 1: QKV projection + normalised multi-head attention for a batch tile.
# Output layout per batch element is (d, H*N)  ==  permute(0,3,1,2) flattened,
# so the wrapper-side scramble is a pure reshape.
# ----------------------------------------------------------------------------
def _attn_kernel(tempvec_ref, x_ref, wqkv_t_ref, out_ref, *, num_heads, head_dim,
                 eps):
    Bt, N, C = x_ref.shape

    # One big QKV matmul: (Bt*N, C) x (C, 3C).  bf16 operands, f32 accumulation.
    x2d = x_ref[...].reshape(Bt * N, C).astype(jnp.bfloat16)
    qkvv = jnp.dot(x2d, wqkv_t_ref[...],
                   preferred_element_type=jnp.float32)          # (Bt*N, 3C) f32

    for b in range(Bt):                     # static loop, Bt is small
        rows = slice(b * N, (b + 1) * N)
        q_all = qkvv[rows, 0:C]             # (N, C)
        k_all = qkvv[rows, C:2 * C]         # (N, C)
        v_all = qkvv[rows, 2 * C:3 * C]     # (N, C)

        # F.normalize(dim=-1) on the (H, d, N) view == per-(head, channel) L2
        # norm over the token axis; done full-width across all heads at once.
        qss = jnp.sum(q_all * q_all, axis=0, keepdims=True)     # (1, C)
        kss = jnp.sum(k_all * k_all, axis=0, keepdims=True)     # (1, C)
        q_hat = q_all * jax.lax.rsqrt(jnp.maximum(qss, eps * eps))
        k_hat = k_all * jax.lax.rsqrt(jnp.maximum(kss, eps * eps))
        # Fold per-head temperature2 into q before QK^T (scalar per head).
        q_hat = q_hat * tempvec_ref[...]                        # (1, C) bcast

        q_bf = q_hat.astype(jnp.bfloat16)
        k_bf = k_hat.astype(jnp.bfloat16)
        v_bf = v_all.astype(jnp.bfloat16)

        for h in range(num_heads):          # static loop, H is small
            lo = h * head_dim
            hi = lo + head_dim
            qh = q_bf[:, lo:hi]             # (N, d)
            kh = k_bf[:, lo:hi]             # (N, d)
            vh = v_bf[:, lo:hi]             # (N, d)

            # scores[n, m] = sum_d qh[n, d] * kh[m, d]  -> (N, N), f32 acc.
            scores = jax.lax.dot_general(
                qh, kh, (((1,), (1,)), ((), ())),
                preferred_element_type=jnp.float32)
            p = jax.nn.softmax(scores, axis=-1)       # f32 elementwise
            # attn_drop / attn_drop_2: identity at inference.

            # z = (attn @ v)^T produced directly in (d, N) layout.
            z = jax.lax.dot_general(
                vh, p.astype(jnp.bfloat16), (((0,), (1,)), ((), ())),
                preferred_element_type=jnp.float32)   # (d, N)
            out_ref[b, :, h * N:(h + 1) * N] = z.astype(out_ref.dtype)


# ----------------------------------------------------------------------------
# Kernel 2: output projection, tiled over rows (lane-dense (rm, C) blocks).
# ----------------------------------------------------------------------------
def _proj_kernel(y_ref, wout_t_ref, b_ref, o_ref):
    y_bf = y_ref[...].astype(jnp.bfloat16)
    acc = jnp.dot(y_bf, wout_t_ref[...], preferred_element_type=jnp.float32)
    o_ref[...] = (acc + b_ref[...]).astype(o_ref.dtype)


def self_attention_pallas(x, w_qkv, temperature2, w_out, b_out, *, num_heads,
                          batch_tile=None, row_tile=512):
    B, N, C = x.shape
    assert C % num_heads == 0
    H = num_heads
    d = C // H

    Bt = B if batch_tile is None else batch_tile
    assert B % Bt == 0

    # Parameter prep (glue): pre-transpose + bf16-cast the matmul weights once,
    # expand the per-head temperature to a per-channel vector.
    wqkv_t = jnp.transpose(w_qkv).astype(jnp.bfloat16)          # (C, 3C)
    wout_t = jnp.transpose(w_out).astype(jnp.bfloat16)          # (C, C)
    temp_vec = jnp.repeat(
        temperature2.reshape(H).astype(jnp.float32), d).reshape(1, C)

    attn_t = pl.pallas_call(
        functools.partial(_attn_kernel, num_heads=H, head_dim=d, eps=1e-12),
        out_shape=jax.ShapeDtypeStruct((B, d, H * N), jnp.float32),
        grid=(B // Bt,),
        in_specs=[
            pl.BlockSpec((1, C), lambda b: (0, 0)),             # temperature/chan
            pl.BlockSpec((Bt, N, C), lambda b: (b, 0, 0)),      # x batch tile
            # Constant index_map => block reused across grid steps (no re-DMA).
            pl.BlockSpec((C, 3 * C), lambda b: (0, 0)),         # qkv weight
        ],
        out_specs=pl.BlockSpec((Bt, d, H * N), lambda b: (b, 0, 0)),
        compiler_params=pltpu.CompilerParams(
            dimension_semantics=("parallel",)),
    )(temp_vec, x, wqkv_t)

    # Exact PyTorch scramble permute(0,3,1,2).reshape(B,N,C): the kernel already
    # emitted the (d, H, N)-ordered layout, so this is a pure reshape.
    y2d = attn_t.reshape(B * N, C)

    rows = B * N
    rm = rows if rows <= row_tile else row_tile
    if rows % rm != 0:
        rm = rows   # TODO(synk): pad ragged row counts for very large B*N
    out2d = pl.pallas_call(
        _proj_kernel,
        out_shape=jax.ShapeDtypeStruct((rows, C), jnp.float32),
        grid=(rows // rm,),
        in_specs=[
            pl.BlockSpec((rm, C), lambda i: (i, 0)),            # y row tile
            pl.BlockSpec((C, C), lambda i: (0, 0)),             # out weight
            pl.BlockSpec((1, C), lambda i: (0, 0)),             # bias
        ],
        out_specs=pl.BlockSpec((rm, C), lambda i: (i, 0)),
        compiler_params=pltpu.CompilerParams(
            dimension_semantics=("parallel",)),
    )(y2d, wout_t, b_out.reshape(1, C).astype(jnp.float32))

    return out2d.reshape(B, N, C)


# ----------------------------------------------------------------------------
# Pure-JAX reference (mirrors the PyTorch forward exactly) for validation.
# ----------------------------------------------------------------------------
def self_attention_ref(x, w_qkv, temperature2, w_out, b_out, *, num_heads):
    B, N, C = x.shape
    d = C // num_heads
    qkvv = jnp.einsum("bnc,oc->bno", x, w_qkv)               # Linear, no bias
    qkvv = qkvv.reshape(B, N, 3, num_heads, d)
    qkvv = jnp.transpose(qkvv, (2, 0, 3, 1, 4))              # (3, B, H, N, d)
    q, k, v = qkvv[0], qkvv[1], qkvv[2]
    q = jnp.swapaxes(q, -2, -1)                              # (B, H, d, N)
    k = jnp.swapaxes(k, -2, -1)
    v = jnp.swapaxes(v, -2, -1)
    q = q / jnp.maximum(jnp.linalg.norm(q, axis=-1, keepdims=True), 1e-12)
    k = k / jnp.maximum(jnp.linalg.norm(k, axis=-1, keepdims=True), 1e-12)
    attn = jnp.einsum("bhdn,bhdm->bhnm", q, k)
    attn = attn * temperature2.reshape(1, num_heads, 1, 1)
    attn = jax.nn.softmax(attn, axis=-1)
    xs = jnp.einsum("bhnm,bhdm->bhnd", attn, v)              # (B, H, N, d)
    xs = jnp.transpose(xs, (0, 3, 1, 2)).reshape(B, N, C)
    return xs @ w_out.T + b_out


if __name__ == "__main__":
    # Small shapes consistent with the module: hidden_size=32, 4 heads, seq=16.
    B, N, C, H = 2, 16, 32, 4

    key = jax.random.PRNGKey(0)
    k1, k2, k3, kx = jax.random.split(key, 4)
    w_qkv = jax.random.normal(k1, (3 * C, C), jnp.float32) * 0.05   # Linear(C, 3C, bias=False)
    w_out = jax.random.normal(k2, (C, C), jnp.float32) * 0.05       # Linear(C, C)
    b_out = jax.random.normal(k3, (C,), jnp.float32) * 0.05
    temperature2 = jnp.ones((H, 1, 1), jnp.float32)                 # nn.Parameter(torch.ones(H,1,1))
    x = jax.random.normal(kx, (B, N, C), jnp.float32)

    out = self_attention_pallas(x, w_qkv, temperature2, w_out, b_out, num_heads=H)
    out = jax.block_until_ready(out)

    ref = self_attention_ref(x, w_qkv, temperature2, w_out, b_out, num_heads=H)
    assert out.shape == (B, N, C)
    # bf16 MXU operands (f32 accumulation) -> slightly relaxed tolerance.
    assert jnp.allclose(out, ref, rtol=1e-2, atol=1e-2), (
        f"max abs diff = {jnp.max(jnp.abs(out - ref))}")

    print("KERNEL_OK")
</pallas_src>

<mosaic_0001>
module attributes {stable_mosaic.version = 11 : i64} {
  func.func @_attn_kernel(%arg0: i32, %arg1: memref<1x32xf32, #tpu.memory_space<vmem>>, %arg2: memref<2x16x32xf32, #tpu.memory_space<vmem>>, %arg3: memref<32x96xbf16, #tpu.memory_space<vmem>>, %arg4: memref<2x8x64xf32, #tpu.memory_space<vmem>>) attributes {dimension_semantics = [#tpu.dimension_semantics<parallel>], iteration_bounds = array<i64: 1>, scalar_prefetch = 0 : i64, scratch_operands = 0 : i64, tpu.core_type = #tpu.core_type<tc>, window_params = [{pipeline_mode = #tpu.pipeline_mode<synchronous>, transform_indices = @transform_0, window_bounds = array<i64: 1, 32>}, {transform_indices = @transform_1, window_bounds = array<i64: 2, 16, 32>}, {pipeline_mode = #tpu.pipeline_mode<synchronous>, transform_indices = @transform_2, window_bounds = array<i64: 32, 96>}, {transform_indices = @transform_3, window_bounds = array<i64: 2, 8, 64>}]} {
    %c0 = arith.constant 0 : index
    %c0_0 = arith.constant 0 : index
    %c0_1 = arith.constant 0 : index
    %0 = vector.load %arg2[%c0, %c0_0, %c0_1] : memref<2x16x32xf32, #tpu.memory_space<vmem>>, vector<2x16x32xf32>
    %1 = vector.shape_cast %0 : vector<2x16x32xf32> to vector<32x32xf32>
    %2 = arith.truncf %1 : vector<32x32xf32> to vector<32x32xbf16>
    %c0_2 = arith.constant 0 : index
    %c0_3 = arith.constant 0 : index
    %3 = vector.load %arg3[%c0_2, %c0_3] : memref<32x96xbf16, #tpu.memory_space<vmem>>, vector<32x96xbf16>
    %cst = arith.constant dense<0.000000e+00> : vector<32x96xf32>
    %4 = tpu.matmul %2, %3, %cst {dimension_numbers = #tpu.dot_dimension_numbers<[1], [0], [0], [1], [0, 0, 1, 1], [], []>} : vector<32x32xbf16>, vector<32x96xbf16>, vector<32x96xf32> -> vector<32x96xf32>
    %5 = vector.extract_strided_slice %4 {offsets = [0, 0], sizes = [16, 32], strides = [1, 1]} : vector<32x96xf32> to vector<16x32xf32>
    %6 = vector.extract_strided_slice %4 {offsets = [0, 32], sizes = [16, 32], strides = [1, 1]} : vector<32x96xf32> to vector<16x32xf32>
    %7 = vector.extract_strided_slice %4 {offsets = [0, 64], sizes = [16, 32], strides = [1, 1]} : vector<32x96xf32> to vector<16x32xf32>
    %8 = arith.mulf %5, %5 : vector<16x32xf32>
    %cst_4 = arith.constant dense<0.000000e+00> : vector<32xf32>
    %9 = vector.multi_reduction <add>, %8, %cst_4 [0] : vector<16x32xf32> to vector<32xf32>
    %10 = vector.shape_cast %9 : vector<32xf32> to vector<1x32xf32>
    %11 = arith.mulf %6, %6 : vector<16x32xf32>
    %cst_5 = arith.constant dense<0.000000e+00> : vector<32xf32>
    %12 = vector.multi_reduction <add>, %11, %cst_5 [0] : vector<16x32xf32> to vector<32xf32>
    %13 = vector.shape_cast %12 : vector<32xf32> to vector<1x32xf32>
    %cst_6 = arith.constant 1.000000e-24 : f32
    %14 = vector.broadcast %cst_6 : f32 to vector<1x32xf32>
    %15 = arith.maximumf %10, %14 : vector<1x32xf32>
    %16 = math.rsqrt %15 : vector<1x32xf32>
    %17 = vector.broadcast %16 : vector<1x32xf32> to vector<16x32xf32>
    %18 = arith.mulf %5, %17 : vector<16x32xf32>
    %cst_7 = arith.constant 1.000000e-24 : f32
    %19 = vector.broadcast %cst_7 : f32 to vector<1x32xf32>
    %20 = arith.maximumf %13, %19 : vector<1x32xf32>
    %21 = math.rsqrt %20 : vector<1x32xf32>
    %22 = vector.broadcast %21 : vector<1x32xf32> to vector<16x32xf32>
    %23 = arith.mulf %6, %22 : vector<16x32xf32>
    %c0_8 = arith.constant 0 : index
    %c0_9 = arith.constant 0 : index
    %24 = vector.load %arg1[%c0_8, %c0_9] : memref<1x32xf32, #tpu.memory_space<vmem>>, vector<1x32xf32>
    %25 = vector.broadcast %24 : vector<1x32xf32> to vector<16x32xf32>
    %26 = arith.mulf %18, %25 : vector<16x32xf32>
    %27 = arith.truncf %26 : vector<16x32xf32> to vector<16x32xbf16>
    %28 = arith.truncf %23 : vector<16x32xf32> to vector<16x32xbf16>
    %29 = arith.truncf %7 : vector<16x32xf32> to vector<16x32xbf16>
    %30 = vector.extract_strided_slice %27 {offsets = [0, 0], sizes = [16, 8], strides = [1, 1]} : vector<16x32xbf16> to vector<16x8xbf16>
    %31 = vector.extract_strided_slice %28 {offsets = [0, 0], sizes = [16, 8], strides = [1, 1]} : vector<16x32xbf16> to vector<16x8xbf16>
    %32 = vector.extract_strided_slice %29 {offsets = [0, 0], sizes = [16, 8], strides = [1, 1]} : vector<16x32xbf16> to vector<16x8xbf16>
    %cst_10 = arith.constant dense<0.000000e+00> : vector<16x16xf32>
    %33 = tpu.matmul %30, %31, %cst_10 {dimension_numbers = #tpu.dot_dimension_numbers<[1], [1], [0], [0], [0, 0, 1, 0], [], []>} : vector<16x8xbf16>, vector<16x8xbf16>, vector<16x16xf32> -> vector<16x16xf32>
    %cst_11 = arith.constant dense<0xFF800000> : vector<16xf32>
    %34 = vector.multi_reduction <maximumf>, %33, %cst_11 [1] : vector<16x16xf32> to vector<16xf32>
    %cst_12 = arith.constant 0xFF800000 : f32
    %35 = vector.broadcast %cst_12 : f32 to vector<16xf32>
    %36 = arith.maximumf %35, %34 : vector<16xf32>
    %37 = vector.shape_cast %36 : vector<16xf32> to vector<16x1xf32>
    %38 = vector.broadcast %37 : vector<16x1xf32> to vector<16x16xf32>
    %39 = arith.subf %33, %38 : vector<16x16xf32>
    %40 = math.exp %39 : vector<16x16xf32>
    %cst_13 = arith.constant dense<0.000000e+00> : vector<16xf32>
    %41 = vector.multi_reduction <add>, %40, %cst_13 [1] : vector<16x16xf32> to vector<16xf32>
    %42 = vector.shape_cast %41 : vector<16xf32> to vector<16x1xf32>
    %43 = vector.broadcast %42 : vector<16x1xf32> to vector<16x16xf32>
    %44 = arith.divf %40, %43 : vector<16x16xf32>
    %45 = arith.truncf %44 : vector<16x16xf32> to vector<16x16xbf16>
    %cst_14 = arith.constant dense<0.000000e+00> : vector<8x16xf32>
    %46 = tpu.matmul %32, %45, %cst_14 {dimension_numbers = #tpu.dot_dimension_numbers<[0], [1], [1], [0], [0, 1, 1, 0], [], []>} : vector<16x8xbf16>, vector<16x16xbf16>, vector<8x16xf32> -> vector<8x16xf32>
    %c0_15 = arith.constant 0 : index
    %c0_16 = arith.constant 0 : index
    %c0_17 = arith.constant 0 : index
    %47 = vector.load %arg4[%c0_15, %c0_16, %c0_17] : memref<2x8x64xf32, #tpu.memory_space<vmem>>, vector<1x8x16xf32>
    %48 = vector.shape_cast %47 : vector<1x8x16xf32> to vector<8x16xf32>
    %49 = vector.shape_cast %46 : vector<8x16xf32> to vector<1x8x16xf32>
    tpu.vector_store %arg4[%c0_15, %c0_16, %c0_17], %49 {strides = array<i32>} : memref<2x8x64xf32, #tpu.memory_space<vmem>>, vector<1x8x16xf32>,
    %50 = vector.extract_strided_slice %27 {offsets = [0, 8], sizes = [16, 8], strides = [1, 1]} : vector<16x32xbf16> to vector<16x8xbf16>
    %51 = vector.extract_strided_slice %28 {offsets = [0, 8], sizes = [16, 8], strides = [1, 1]} : vector<16x32xbf16> to vector<16x8xbf16>
    %52 = vector.extract_strided_slice %29 {offsets = [0, 8], sizes = [16, 8], strides = [1, 1]} : vector<16x32xbf16> to vector<16x8xbf16>
    %cst_18 = arith.constant dense<0.000000e+00> : vector<16x16xf32>
    %53 = tpu.matmul %50, %51, %cst_18 {dimension_numbers = #tpu.dot_dimension_numbers<[1], [1], [0], [0], [0, 0, 1, 0], [], []>} : vector<16x8xbf16>, vector<16x8xbf16>, vector<16x16xf32> -> vector<16x16xf32>
    %cst_19 = arith.constant dense<0xFF800000> : vector<16xf32>
    %54 = vector.multi_reduction <maximumf>, %53, %cst_19 [1] : vector<16x16xf32> to vector<16xf32>
    %cst_20 = arith.constant 0xFF800000 : f32
    %55 = vector.broadcast %cst_20 : f32 to vector<16xf32>
    %56 = arith.maximumf %55, %54 : vector<16xf32>
    %57 = vector.shape_cast %56 : vector<16xf32> to vector<16x1xf32>
    %58 = vector.broadcast %57 : vector<16x1xf32> to vector<16x16xf32>
    %59 = arith.subf %53, %58 : vector<16x16xf32>
    %60 = math.exp %59 : vector<16x16xf32>
    %cst_21 = arith.constant dense<0.000000e+00> : vector<16xf32>
    %61 = vector.multi_reduction <add>, %60, %cst_21 [1] : vector<16x16xf32> to vector<16xf32>
    %62 = vector.shape_cast %61 : vector<16xf32> to vector<16x1xf32>
    %63 = vector.broadcast %62 : vector<16x1xf32> to vector<16x16xf32>
    %64 = arith.divf %60, %63 : vector<16x16xf32>
    %65 = arith.truncf %64 : vector<16x16xf32> to vector<16x16xbf16>
    %cst_22 = arith.constant dense<0.000000e+00> : vector<8x16xf32>
    %66 = tpu.matmul %52, %65, %cst_22 {dimension_numbers = #tpu.dot_dimension_numbers<[0], [1], [1], [0], [0, 1, 1, 0], [], []>} : vector<16x8xbf16>, vector<16x16xbf16>, vector<8x16xf32> -> vector<8x16xf32>
    %c0_23 = arith.constant 0 : index
    %c0_24 = arith.constant 0 : index
    %c16 = arith.constant 16 : index
    %67 = vector.load %arg4[%c0_23, %c0_24, %c16] : memref<2x8x64xf32, #tpu.memory_space<vmem>>, vector<1x8x16xf32>
    %68 = vector.shape_cast %67 : vector<1x8x16xf32> to vector<8x16xf32>
    %69 = vector.shape_cast %66 : vector<8x16xf32> to vector<1x8x16xf32>
    tpu.vector_store %arg4[%c0_23, %c0_24, %c16], %69 {strides = array<i32>} : memref<2x8x64xf32, #tpu.memory_space<vmem>>, vector<1x8x16xf32>,
    %70 = vector.extract_strided_slice %27 {offsets = [0, 16], sizes = [16, 8], strides = [1, 1]} : vector<16x32xbf16> to vector<16x8xbf16>
    %71 = vector.extract_strided_slice %28 {offsets = [0, 16], sizes = [16, 8], strides = [1, 1]} : vector<16x32xbf16> to vector<16x8xbf16>
    %72 = vector.extract_strided_slice %29 {offsets = [0, 16], sizes = [16, 8], strides = [1, 1]} : vector<16x32xbf16> to vector<16x8xbf16>
    %cst_25 = arith.constant dense<0.000000e+00> : vector<16x16xf32>
    %73 = tpu.matmul %70, %71, %cst_25 {dimension_numbers = #tpu.dot_dimension_numbers<[1], [1], [0], [0], [0, 0, 1, 0], [], []>} : vector<16x8xbf16>, vector<16x8xbf16>, vector<16x16xf32> -> vector<16x16xf32>
    %cst_26 = arith.constant dense<0xFF800000> : vector<16xf32>
    %74 = vector.multi_reduction <maximumf>, %73, %cst_26 [1] : vector<16x16xf32> to vector<16xf32>
    %cst_27 = arith.constant 0xFF800000 : f32
    %75 = vector.broadcast %cst_27 : f32 to vector<16xf32>
    %76 = arith.maximumf %75, %74 : vector<16xf32>
    %77 = vector.shape_cast %76 : vector<16xf32> to vector<16x1xf32>
    %78 = vector.broadcast %77 : vector<16x1xf32> to vector<16x16xf32>
    %79 = arith.subf %73, %78 : vector<16x16xf32>
    %80 = math.exp %79 : vector<16x16xf32>
    %cst_28 = arith.constant dense<0.000000e+00> : vector<16xf32>
    %81 = vector.multi_reduction <add>, %80, %cst_28 [1] : vector<16x16xf32> to vector<16xf32>
    %82 = vector.shape_cast %81 : vector<16xf32> to vector<16x1xf32>
    %83 = vector.broadcast %82 : vector<16x1xf32> to vector<16x16xf32>
    %84 = arith.divf %80, %83 : vector<16x16xf32>
    %85 = arith.truncf %84 : vector<16x16xf32> to vector<16x16xbf16>
    %cst_29 = arith.constant dense<0.000000e+00> : vector<8x16xf32>
    %86 = tpu.matmul %72, %85, %cst_29 {dimension_numbers = #tpu.dot_dimension_numbers<[0], [1], [1], [0], [0, 1, 1, 0], [], []>} : vector<16x8xbf16>, vector<16x16xbf16>, vector<8x16xf32> -> vector<8x16xf32>
    %c0_30 = arith.constant 0 : index
    %c0_31 = arith.constant 0 : index
    %c32 = arith.constant 32 : index
    %87 = vector.load %arg4[%c0_30, %c0_31, %c32] : memref<2x8x64xf32, #tpu.memory_space<vmem>>, vector<1x8x16xf32>
    %88 = vector.shape_cast %87 : vector<1x8x16xf32> to vector<8x16xf32>
    %89 = vector.shape_cast %86 : vector<8x16xf32> to vector<1x8x16xf32>
    tpu.vector_store %arg4[%c0_30, %c0_31, %c32], %89 {strides = array<i32>} : memref<2x8x64xf32, #tpu.memory_space<vmem>>, vector<1x8x16xf32>,
    %90 = vector.extract_strided_slice %27 {offsets = [0, 24], sizes = [16, 8], strides = [1, 1]} : vector<16x32xbf16> to vector<16x8xbf16>
    %91 = vector.extract_strided_slice %28 {offsets = [0, 24], sizes = [16, 8], strides = [1, 1]} : vector<16x32xbf16> to vector<16x8xbf16>
    %92 = vector.extract_strided_slice %29 {offsets = [0, 24], sizes = [16, 8], strides = [1, 1]} : vector<16x32xbf16> to vector<16x8xbf16>
    %cst_32 = arith.constant dense<0.000000e+00> : vector<16x16xf32>
    %93 = tpu.matmul %90, %91, %cst_32 {dimension_numbers = #tpu.dot_dimension_numbers<[1], [1], [0], [0], [0, 0, 1, 0], [], []>} : vector<16x8xbf16>, vector<16x8xbf16>, vector<16x16xf32> -> vector<16x16xf32>
    %cst_33 = arith.constant dense<0xFF800000> : vector<16xf32>
    %94 = vector.multi_reduction <maximumf>, %93, %cst_33 [1] : vector<16x16xf32> to vector<16xf32>
    %cst_34 = arith.constant 0xFF800000 : f32
    %95 = vector.broadcast %cst_34 : f32 to vector<16xf32>
    %96 = arith.maximumf %95, %94 : vector<16xf32>
    %97 = vector.shape_cast %96 : vector<16xf32> to vector<16x1xf32>
    %98 = vector.broadcast %97 : vector<16x1xf32> to vector<16x16xf32>
    %99 = arith.subf %93, %98 : vector<16x16xf32>
    %100 = math.exp %99 : vector<16x16xf32>
    %cst_35 = arith.constant dense<0.000000e+00> : vector<16xf32>
    %101 = vector.multi_reduction <add>, %100, %cst_35 [1] : vector<16x16xf32> to vector<16xf32>
    %102 = vector.shape_cast %101 : vector<16xf32> to vector<16x1xf32>
    %103 = vector.broadcast %102 : vector<16x1xf32> to vector<16x16xf32>
    %104 = arith.divf %100, %103 : vector<16x16xf32>
    %105 = arith.truncf %104 : vector<16x16xf32> to vector<16x16xbf16>
    %cst_36 = arith.constant dense<0.000000e+00> : vector<8x16xf32>
    %106 = tpu.matmul %92, %105, %cst_36 {dimension_numbers = #tpu.dot_dimension_numbers<[0], [1], [1], [0], [0, 1, 1, 0], [], []>} : vector<16x8xbf16>, vector<16x16xbf16>, vector<8x16xf32> -> vector<8x16xf32>
    %c0_37 = arith.constant 0 : index
    %c0_38 = arith.constant 0 : index
    %c48 = arith.constant 48 : index
    %107 = vector.load %arg4[%c0_37, %c0_38, %c48] : memref<2x8x64xf32, #tpu.memory_space<vmem>>, vector<1x8x16xf32>
    %108 = vector.shape_cast %107 : vector<1x8x16xf32> to vector<8x16xf32>
    %109 = vector.shape_cast %106 : vector<8x16xf32> to vector<1x8x16xf32>
    tpu.vector_store %arg4[%c0_37, %c0_38, %c48], %109 {strides = array<i32>} : memref<2x8x64xf32, #tpu.memory_space<vmem>>, vector<1x8x16xf32>,
    %110 = vector.extract_strided_slice %4 {offsets = [16, 0], sizes = [16, 32], strides = [1, 1]} : vector<32x96xf32> to vector<16x32xf32>
    %111 = vector.extract_strided_slice %4 {offsets = [16, 32], sizes = [16, 32], strides = [1, 1]} : vector<32x96xf32> to vector<16x32xf32>
    %112 = vector.extract_strided_slice %4 {offsets = [16, 64], sizes = [16, 32], strides = [1, 1]} : vector<32x96xf32> to vector<16x32xf32>
    %113 = arith.mulf %110, %110 : vector<16x32xf32>
    %cst_39 = arith.constant dense<0.000000e+00> : vector<32xf32>
    %114 = vector.multi_reduction <add>, %113, %cst_39 [0] : vector<16x32xf32> to vector<32xf32>
    %115 = vector.shape_cast %114 : vector<32xf32> to vector<1x32xf32>
    %116 = arith.mulf %111, %111 : vector<16x32xf32>
    %cst_40 = arith.constant dense<0.000000e+00> : vector<32xf32>
    %117 = vector.multi_reduction <add>, %116, %cst_40 [0] : vector<16x32xf32> to vector<32xf32>
    %118 = vector.shape_cast %117 : vector<32xf32> to vector<1x32xf32>
    %cst_41 = arith.constant 1.000000e-24 : f32
    %119 = vector.broadcast %cst_41 : f32 to vector<1x32xf32>
    %120 = arith.maximumf %115, %119 : vector<1x32xf32>
    %121 = math.rsqrt %120 : vector<1x32xf32>
    %122 = vector.broadcast %121 : vector<1x32xf32> to vector<16x32xf32>
    %123 = arith.mulf %110, %122 : vector<16x32xf32>
    %cst_42 = arith.constant 1.000000e-24 : f32
    %124 = vector.broadcast %cst_42 : f32 to vector<1x32xf32>
    %125 = arith.maximumf %118, %124 : vector<1x32xf32>
    %126 = math.rsqrt %125 : vector<1x32xf32>
    %127 = vector.broadcast %126 : vector<1x32xf32> to vector<16x32xf32>
    %128 = arith.mulf %111, %127 : vector<16x32xf32>
    %c0_43 = arith.constant 0 : index
    %c0_44 = arith.constant 0 : index
    %129 = vector.load %arg1[%c0_43, %c0_44] : memref<1x32xf32, #tpu.memory_space<vmem>>, vector<1x32xf32>
    %130 = vector.broadcast %129 : vector<1x32xf32> to vector<16x32xf32>
    %131 = arith.mulf %123, %130 : vector<16x32xf32>
    %132 = arith.truncf %131 : vector<16x32xf32> to vector<16x32xbf16>
    %133 = arith.truncf %128 : vector<16x32xf32> to vector<16x32xbf16>
    %134 = arith.truncf %112 : vector<16x32xf32> to vector<16x32xbf16>
    %135 = vector.extract_strided_slice %132 {offsets = [0, 0], sizes = [16, 8], strides = [1, 1]} : vector<16x32xbf16> to vector<16x8xbf16>
    %136 = vector.extract_strided_slice %133 {offsets = [0, 0], sizes = [16, 8], strides = [1, 1]} : vector<16x32xbf16> to vector<16x8xbf16>
    %137 = vector.extract_strided_slice %134 {offsets = [0, 0], sizes = [16, 8], strides = [1, 1]} : vector<16x32xbf16> to vector<16x8xbf16>
    %cst_45 = arith.constant dense<0.000000e+00> : vector<16x16xf32>
    %138 = tpu.matmul %135, %136, %cst_45 {dimension_numbers = #tpu.dot_dimension_numbers<[1], [1], [0], [0], [0, 0, 1, 0], [], []>} : vector<16x8xbf16>, vector<16x8xbf16>, vector<16x16xf32> -> vector<16x16xf32>
    %cst_46 = arith.constant dense<0xFF800000> : vector<16xf32>
    %139 = vector.multi_reduction <maximumf>, %138, %cst_46 [1] : vector<16x16xf32> to vector<16xf32>
    %cst_47 = arith.constant 0xFF800000 : f32
    %140 = vector.broadcast %cst_47 : f32 to vector<16xf32>
    %141 = arith.maximumf %140, %139 : vector<16xf32>
    %142 = vector.shape_cast %141 : vector<16xf32> to vector<16x1xf32>
    %143 = vector.broadcast %142 : vector<16x1xf32> to vector<16x16xf32>
    %144 = arith.subf %138, %143 : vector<16x16xf32>
    %145 = math.exp %144 : vector<16x16xf32>
    %cst_48 = arith.constant dense<0.000000e+00> : vector<16xf32>
    %146 = vector.multi_reduction <add>, %145, %cst_48 [1] : vector<16x16xf32> to vector<16xf32>
    %147 = vector.shape_cast %146 : vector<16xf32> to vector<16x1xf32>
    %148 = vector.broadcast %147 : vector<16x1xf32> to vector<16x16xf32>
    %149 = arith.divf %145, %148 : vector<16x16xf32>
    %150 = arith.truncf %149 : vector<16x16xf32> to vector<16x16xbf16>
    %cst_49 = arith.constant dense<0.000000e+00> : vector<8x16xf32>
    %151 = tpu.matmul %137, %150, %cst_49 {dimension_numbers = #tpu.dot_dimension_numbers<[0], [1], [1], [0], [0, 1, 1, 0], [], []>} : vector<16x8xbf16>, vector<16x16xbf16>, vector<8x16xf32> -> vector<8x16xf32>
    %c1 = arith.constant 1 : index
    %c0_50 = arith.constant 0 : index
    %c0_51 = arith.constant 0 : index
    %152 = vector.load %arg4[%c1, %c0_50, %c0_51] : memref<2x8x64xf32, #tpu.memory_space<vmem>>, vector<1x8x16xf32>
    %153 = vector.shape_cast %152 : vector<1x8x16xf32> to vector<8x16xf32>
    %154 = vector.shape_cast %151 : vector<8x16xf32> to vector<1x8x16xf32>
    tpu.vector_store %arg4[%c1, %c0_50, %c0_51], %154 {strides = array<i32>} : memref<2x8x64xf32, #tpu.memory_space<vmem>>, vector<1x8x16xf32>,
    %155 = vector.extract_strided_slice %132 {offsets = [0, 8], sizes = [16, 8], strides = [1, 1]} : vector<16x32xbf16> to vector<16x8xbf16>
    %156 = vector.extract_strided_slice %133 {offsets = [0, 8], sizes = [16, 8], strides = [1, 1]} : vector<16x32xbf16> to vector<16x8xbf16>
    %157 = vector.extract_strided_slice %134 {offsets = [0, 8], sizes = [16, 8], strides = [1, 1]} : vector<16x32xbf16> to vector<16x8xbf16>
    %cst_52 = arith.constant dense<0.000000e+00> : vector<16x16xf32>
    %158 = tpu.matmul %155, %156, %cst_52 {dimension_numbers = #tpu.dot_dimension_numbers<[1], [1], [0], [0], [0, 0, 1, 0], [], []>} : vector<16x8xbf16>, vector<16x8xbf16>, vector<16x16xf32> -> vector<16x16xf32>
    %cst_53 = arith.constant dense<0xFF800000> : vector<16xf32>
    %159 = vector.multi_reduction <maximumf>, %158, %cst_53 [1] : vector<16x16xf32> to vector<16xf32>
    %cst_54 = arith.constant 0xFF800000 : f32
    %160 = vector.broadcast %cst_54 : f32 to vector<16xf32>
    %161 = arith.maximumf %160, %159 : vector<16xf32>
    %162 = vector.shape_cast %161 : vector<16xf32> to vector<16x1xf32>
    %163 = vector.broadcast %162 : vector<16x1xf32> to vector<16x16xf32>
    %164 = arith.subf %158, %163 : vector<16x16xf32>
    %165 = math.exp %164 : vector<16x16xf32>
    %cst_55 = arith.constant dense<0.000000e+00> : vector<16xf32>
    %166 = vector.multi_reduction <add>, %165, %cst_55 [1] : vector<16x16xf32> to vector<16xf32>
    %167 = vector.shape_cast %166 : vector<16xf32> to vector<16x1xf32>
    %168 = vector.broadcast %167 : vector<16x1xf32> to vector<16x16xf32>
    %169 = arith.divf %165, %168 : vector<16x16xf32>
    %170 = arith.truncf %169 : vector<16x16xf32> to vector<16x16xbf16>
    %cst_56 = arith.constant dense<0.000000e+00> : vector<8x16xf32>
    %171 = tpu.matmul %157, %170, %cst_56 {dimension_numbers = #tpu.dot_dimension_numbers<[0], [1], [1], [0], [0, 1, 1, 0], [], []>} : vector<16x8xbf16>, vector<16x16xbf16>, vector<8x16xf32> -> vector<8x16xf32>
    %c1_57 = arith.constant 1 : index
    %c0_58 = arith.constant 0 : index
    %c16_59 = arith.constant 16 : index
    %172 = vector.load %arg4[%c1_57, %c0_58, %c16_59] : memref<2x8x64xf32, #tpu.memory_space<vmem>>, vector<1x8x16xf32>
    %173 = vector.shape_cast %172 : vector<1x8x16xf32> to vector<8x16xf32>
    %174 = vector.shape_cast %171 : vector<8x16xf32> to vector<1x8x16xf32>
    tpu.vector_store %arg4[%c1_57, %c0_58, %c16_59], %174 {strides = array<i32>} : memref<2x8x64xf32, #tpu.memory_space<vmem>>, vector<1x8x16xf32>,
    %175 = vector.extract_strided_slice %132 {offsets = [0, 16], sizes = [16, 8], strides = [1, 1]} : vector<16x32xbf16> to vector<16x8xbf16>
    %176 = vector.extract_strided_slice %133 {offsets = [0, 16], sizes = [16, 8], strides = [1, 1]} : vector<16x32xbf16> to vector<16x8xbf16>
    %177 = vector.extract_strided_slice %134 {offsets = [0, 16], sizes = [16, 8], strides = [1, 1]} : vector<16x32xbf16> to vector<16x8xbf16>
    %cst_60 = arith.constant dense<0.000000e+00> : vector<16x16xf32>
    %178 = tpu.matmul %175, %176, %cst_60 {dimension_numbers = #tpu.dot_dimension_numbers<[1], [1], [0], [0], [0, 0, 1, 0], [], []>} : vector<16x8xbf16>, vector<16x8xbf16>, vector<16x16xf32> -> vector<16x16xf32>
    %cst_61 = arith.constant dense<0xFF800000> : vector<16xf32>
    %179 = vector.multi_reduction <maximumf>, %178, %cst_61 [1] : vector<16x16xf32> to vector<16xf32>
    %cst_62 = arith.constant 0xFF800000 : f32
    %180 = vector.broadcast %cst_62 : f32 to vector<16xf32>
    %181 = arith.maximumf %180, %179 : vector<16xf32>
    %182 = vector.shape_cast %181 : vector<16xf32> to vector<16x1xf32>
    %183 = vector.broadcast %182 : vector<16x1xf32> to vector<16x16xf32>
    %184 = arith.subf %178, %183 : vector<16x16xf32>
    %185 = math.exp %184 : vector<16x16xf32>
    %cst_63 = arith.constant dense<0.000000e+00> : vector<16xf32>
    %186 = vector.multi_reduction <add>, %185, %cst_63 [1] : vector<16x16xf32> to vector<16xf32>
    %187 = vector.shape_cast %186 : vector<16xf32> to vector<16x1xf32>
    %188 = vector.broadcast %187 : vector<16x1xf32> to vector<16x16xf32>
    %189 = arith.divf %185, %188 : vector<16x16xf32>
    %190 = arith.truncf %189 : vector<16x16xf32> to vector<16x16xbf16>
    %cst_64 = arith.constant dense<0.000000e+00> : vector<8x16xf32>
    %191 = tpu.matmul %177, %190, %cst_64 {dimension_numbers = #tpu.dot_dimension_numbers<[0], [1], [1], [0], [0, 1, 1, 0], [], []>} : vector<16x8xbf16>, vector<16x16xbf16>, vector<8x16xf32> -> vector<8x16xf32>
    %c1_65 = arith.constant 1 : index
    %c0_66 = arith.constant 0 : index
    %c32_67 = arith.constant 32 : index
    %192 = vector.load %arg4[%c1_65, %c0_66, %c32_67] : memref<2x8x64xf32, #tpu.memory_space<vmem>>, vector<1x8x16xf32>
    %193 = vector.shape_cast %192 : vector<1x8x16xf32> to vector<8x16xf32>
    %194 = vector.shape_cast %191 : vector<8x16xf32> to vector<1x8x16xf32>
    tpu.vector_store %arg4[%c1_65, %c0_66, %c32_67], %194 {strides = array<i32>} : memref<2x8x64xf32, #tpu.memory_space<vmem>>, vector<1x8x16xf32>,
    %195 = vector.extract_strided_slice %132 {offsets = [0, 24], sizes = [16, 8], strides = [1, 1]} : vector<16x32xbf16> to vector<16x8xbf16>
    %196 = vector.extract_strided_slice %133 {offsets = [0, 24], sizes = [16, 8], strides = [1, 1]} : vector<16x32xbf16> to vector<16x8xbf16>
    %197 = vector.extract_strided_slice %134 {offsets = [0, 24], sizes = [16, 8], strides = [1, 1]} : vector<16x32xbf16> to vector<16x8xbf16>
    %cst_68 = arith.constant dense<0.000000e+00> : vector<16x16xf32>
    %198 = tpu.matmul %195, %196, %cst_68 {dimension_numbers = #tpu.dot_dimension_numbers<[1], [1], [0], [0], [0, 0, 1, 0], [], []>} : vector<16x8xbf16>, vector<16x8xbf16>, vector<16x16xf32> -> vector<16x16xf32>
    %cst_69 = arith.constant dense<0xFF800000> : vector<16xf32>
    %199 = vector.multi_reduction <maximumf>, %198, %cst_69 [1] : vector<16x16xf32> to vector<16xf32>
    %cst_70 = arith.constant 0xFF800000 : f32
    %200 = vector.broadcast %cst_70 : f32 to vector<16xf32>
    %201 = arith.maximumf %200, %199 : vector<16xf32>
    %202 = vector.shape_cast %201 : vector<16xf32> to vector<16x1xf32>
    %203 = vector.broadcast %202 : vector<16x1xf32> to vector<16x16xf32>
    %204 = arith.subf %198, %203 : vector<16x16xf32>
    %205 = math.exp %204 : vector<16x16xf32>
    %cst_71 = arith.constant dense<0.000000e+00> : vector<16xf32>
    %206 = vector.multi_reduction <add>, %205, %cst_71 [1] : vector<16x16xf32> to vector<16xf32>
    %207 = vector.shape_cast %206 : vector<16xf32> to vector<16x1xf32>
    %208 = vector.broadcast %207 : vector<16x1xf32> to vector<16x16xf32>
    %209 = arith.divf %205, %208 : vector<16x16xf32>
    %210 = arith.truncf %209 : vector<16x16xf32> to vector<16x16xbf16>
    %cst_72 = arith.constant dense<0.000000e+00> : vector<8x16xf32>
    %211 = tpu.matmul %197, %210, %cst_72 {dimension_numbers = #tpu.dot_dimension_numbers<[0], [1], [1], [0], [0, 1, 1, 0], [], []>} : vector<16x8xbf16>, vector<16x16xbf16>, vector<8x16xf32> -> vector<8x16xf32>
    %c1_73 = arith.constant 1 : index
    %c0_74 = arith.constant 0 : index
    %c48_75 = arith.constant 48 : index
    %212 = vector.load %arg4[%c1_73, %c0_74, %c48_75] : memref<2x8x64xf32, #tpu.memory_space<vmem>>, vector<1x8x16xf32>
    %213 = vector.shape_cast %212 : vector<1x8x16xf32> to vector<8x16xf32>
    %214 = vector.shape_cast %211 : vector<8x16xf32> to vector<1x8x16xf32>
    tpu.vector_store %arg4[%c1_73, %c0_74, %c48_75], %214 {strides = array<i32>} : memref<2x8x64xf32, #tpu.memory_space<vmem>>, vector<1x8x16xf32>,
    return
  }
  func.func @transform_0(%arg0: i32) -> (i32, i32) {
    %c0_i32 = arith.constant 0 : i32
    %c0_i32_0 = arith.constant 0 : i32
    %c0_i32_1 = arith.constant 0 : i32
    return %c0_i32, %c0_i32_0 : i32, i32
  }
  func.func @transform_1(%arg0: i32) -> (i32, i32, i32) {
    %c0_i32 = arith.constant 0 : i32
    %c0_i32_0 = arith.constant 0 : i32
    %c0_i32_1 = arith.constant 0 : i32
    return %arg0, %c0_i32, %c0_i32_0 : i32, i32, i32
  }
  func.func @transform_2(%arg0: i32) -> (i32, i32) {
    %c0_i32 = arith.constant 0 : i32
    %c0_i32_0 = arith.constant 0 : i32
    %c0_i32_1 = arith.constant 0 : i32
    return %c0_i32, %c0_i32_0 : i32, i32
  }
  func.func @transform_3(%arg0: i32) -> (i32, i32, i32) {
    %c0_i32 = arith.constant 0 : i32
    %c0_i32_0 = arith.constant 0 : i32
    %c0_i32_1 = arith.constant 0 : i32
    return %arg0, %c0_i32, %c0_i32_0 : i32, i32, i32
  }
}

</mosaic_0001>

<bundles_post_ra>
// kernel: tpu_custom_call.1
= control target key start
LH: loop header
LB: loop body
LE: loop exit
PB: predicated region body
PF: predicated region fallthrough
CT: control target
= control target key end

     0   :  { %8 = vsyncpa [#allocation3], 0  ;;  %s1785_s0 = inlined_call_operand.hbm [shape: f32[1,32], index: 0, kind: input, shape index: {}]   ;;  %s1786_s1 = inlined_call_operand.hbm [shape: f32[2,16,32], index: 1, kind: input, shape index: {}]   ;;  %s1787_s2 = inlined_call_operand.hbm [shape: bf16[32,96], index: 2, kind: input, shape index: {}]   ;;  %s1788_s3 = inlined_call_operand.hbm [shape: f32[2,8,64], index: 3, kind: output, shape index: {}]  }
   0x1   :  { %9 = vsyncpa [#allocation6], 0  ;;  %s26_s14 = sshll.u32 %s1786_s1, 4  ;;  %s27_s14 = int_to_ptr.hbm [resolvable:$true] %s26_s14 }
   0x2   :  { %10 = vsyncpa [#allocation4], 0  ;;  %s1423_s15 = smov [#allocation5]   ;;  %s16_s19 = sshll.u32 %s1785_s0, 4  ;;  %s17_s19 = int_to_ptr.hbm [resolvable:$true] %s16_s19 }
   0x3   :  { %s28_s16 = sshll.u32 %s1423_s15, 4  ;;  %s1424_s20 = smov 128   ;;  %s29_s16 = int_to_ptr.vmem [resolvable:$true] %s28_s16 }
   0x4   :  { %s1425_s21 = smov 8   ;;  %s1426_s22 = smov [#allocation2]  }
   0x5   :  { %34 = dma.hbm_to_vmem [thread:$0]  %s27_s14, 512, %s29_s16, [#allocation6], %s1424_s20, %s1424_s20, %s1425_s21  }
   0x6   :  { %s18_s23 = sshll.u32 %s1426_s22, 4  ;;  %s39_s25 = sshll.u32 %s1787_s2, 4  ;;  %s19_s23 = int_to_ptr.vmem [resolvable:$true] %s18_s23  ;;  %s40_s25 = int_to_ptr.hbm [resolvable:$true] %s39_s25 }
   0x7   :  { %21 = dma.hbm_to_vmem [thread:$0]  %s17_s19, 16, %s19_s23, [#allocation3]  }
   0x8   :  { %s1427_s26 = smov [#allocation7]   ;;  %s1428_s0 = smov 64  }
   0x9   :  { %s41_s27 = sshll.u32 %s1427_s26, 4  ;;  %s1429_s28 = smov 4   ;;  %s42_s27 = int_to_ptr.vmem [resolvable:$true] %s41_s27 }
   0xa   :  { %47 = dma.hbm_to_vmem [thread:$0]  %s40_s25, 256, %s42_s27, [#allocation6], %s1428_s0, %s1428_s0, %s1429_s28  }
   0xb   :  { %1417 = dma.done.wait [#allocation3], 16  }
   0xc   :  { %1418 = vsyncadd [#allocation3], 4294967280 }
   0xd   :  { %1419 = dma.done.wait [#allocation6], 768  }
   0xe   :  { %1420 = vsyncadd [#allocation6], 4294966528  ;;  %v1225_v0 = vld [vmem:[#allocation7 + $0x8] sm:$0xff]  ;;  %v1224_v1 = vld [vmem:[#allocation7] sm:$0xff]  ;;  %vm83_vm0 = vcmask 261120   ;;  %vm120_vm1 = vcmask 523520  }
   0xf   :  { %96 = vmatpush.bf16.msra.mxu0 %v1225_v0  ;;  %v61_v2 = vld [vmem:[#allocation5] sm:$0xff]  ;;  %v62_v3 = vld [vmem:[#allocation5 + $0x8] sm:$0xff]  ;;  %v1247_v46 = vld [vmem:[#allocation2] ss:$0 sm:$0xff]  ;;  %s1430_s2 = smov 96   ;;  %s1431_s29 = smov 120  }
  0x10   :  { %v65_v4 = vpack.c.bf16 %v62_v3, %v61_v2  ;;  %s1432_s30 = smov 88   ;;  %v63_v3 = vld [vmem:[#allocation5 + $0x10] sm:$0xff]  ;;  %vm180_vm8 = vcmask 64512   ;;  %vm201_vm9 = vcmask 130048   ;;  %s1433_s4 = smov 104  }
  0x11   :  { %s1434_s5 = smov 56   ;;  %s1435_s6 = smov 80  }
  0x12   :  { %s1436_s7 = smov 112   ;;  %s1437_s8 = smov 72  }
  0x13   :  { %97 = vmatpush.bf16.msra.mxu0 %v1224_v1  ;;  %s1438_s9 = smov 48   ;;  %s1439_s10 = smov 40  }
  0x14   :  { %s1440_s11 = smov 16   ;;  %s1441_s12 = smov 32  }
  0x15   :  { %s1442_s13 = smov [#allocation8]   ;;  %s1184_s17 = sshll.u32 %s1788_s3, 4  ;;  %s1185_s17 = int_to_ptr.hbm [resolvable:$true] %s1184_s17 }
  0x16   :  { %1206 = vmatmul.msk.bf16.vlgmr.msra.gmra.mxu0 %vm83_vm0, %v65_v4  ;;  %v64_v4 = vld [vmem:[#allocation5 + $0x18] sm:$0xff]  ;;  %s1182_s14 = sshll.u32 %s1442_s13, 4  ;;  %s1183_s14 = int_to_ptr.vmem [resolvable:$true] %s1182_s14 }
  0x93   :  { %v99_v5 = vpop.f32.mrf.mxu0 }
  0x94   :  { %v109_v6 = vmul.f32 %v99_v5, %v99_v5  ;;  %v166_v7 = vpack.c.bf16 %v99_v5, %v99_v5 }
  0x96   :  { %v111_v11 = vsel %vm83_vm0, %v109_v6, 0.0  ;;  %v121_v12 = vsel %vm120_vm1, %v109_v6, 0.0  ;;  %v253_v13 = vunpack.c.l.b16 %v166_v7 }
  0x9b   :  { %v101_v8 = vpop.f32.mrf.mxu0 }
  0x9c   :  { %v110_v9 = vmul.f32 %v101_v8, %v101_v8  ;;  %v167_v10 = vpack.c.bf16 %v101_v8, %v101_v8 }
  0x9e   :  { %v112_v14 = vsel %vm83_vm0, %v110_v9, 0.0  ;;  %v122_v15 = vsel %vm120_vm1, %v110_v9, 0.0  ;;  %v254_v16 = vunpack.c.l.b16 %v167_v10 }
  0x9f   :  { %v113_v17 = vadd.f32 %v112_v14, %v111_v11  ;;  %v123_v18 = vadd.f32 %v122_v15, %v121_v12 }
  0xa0   :  { %v1482_v19 = vpack.c.b16 %v254_v16, %v253_v13 }
  0xa1   :  { %v114_v20 = vrot.slane %v113_v17, 4  ;;  %v124_v21 = vrot.slane %v123_v18, 4 }
  0xa2   :  { %256 = vrot.lane.b32.xlu2 %v1482_v19, %s1428_s0 }
  0xa3   :  { %v115_v22 = vadd.f32 %v114_v20, %v113_v17  ;;  %v125_v23 = vadd.f32 %v124_v21, %v123_v18 }
  0xa5   :  { %v116_v24 = vrot.slane %v115_v22, 2  ;;  %v126_v25 = vrot.slane %v125_v23, 2 }
  0xa7   :  { %v117_v26 = vadd.f32 %v116_v24, %v115_v22  ;;  %v127_v27 = vadd.f32 %v126_v25, %v125_v23 }
  0xa9   :  { %v118_v28 = vrot.slane %v117_v26, 1  ;;  %v128_v29 = vrot.slane %v127_v27, 1 }
  0xab   :  { %v119_v30 = vadd.f32 %v118_v28, %v117_v26  ;;  %v129_v31 = vadd.f32 %v128_v29, %v127_v27 }
  0xad   :  { %v130_v32 = vmax.f32 %v119_v30, 1e-24  ;;  %v143_v33 = vmax.f32 %v129_v31, 1e-24 }
  0xaf   :  { %1249 = vrsqrt.f32 %v130_v32  ;;  %vm137_vm4 = vweird.f32 %v130_v32  ;;  %vm150_vm6 = vweird.f32 %v143_v33 }
  0xb0   :  { %1251 = vrsqrt.f32 %v143_v33 }
  0xb5   :  { %v1250_v34 = vpop.eup %1249 }
  0xb6   :  { %v1252_v35 = vpop.eup %1251  ;;  %v132_v36 = vmul.f32 %v1250_v34, %v130_v32  ;;  %vm138_vm2 = vweird.f32 %v1250_v34 }
  0xb7   :  { %v145_v37 = vmul.f32 %v1252_v35, %v143_v33  ;;  %vm151_vm3 = vweird.f32 %v1252_v35  ;;  %vm139_vm5 = vmor %vm137_vm4, %vm138_vm2 }
  0xb8   :  { %v133_v38 = vmul.f32 %v1250_v34, %v132_v36  ;;  %vm152_vm7 = vmor %vm150_vm6, %vm151_vm3 }
  0xb9   :  { %v146_v39 = vmul.f32 %v1252_v35, %v145_v37 }
  0xba   :  { %v134_v40 = vmul.f32 0.5, %v133_v38 }
  0xbb   :  { %v147_v41 = vmul.f32 0.5, %v146_v39 }
  0xbc   :  { %v135_v42 = vsub.f32 1.5, %v134_v40 }
  0xbd   :  { %v148_v43 = vsub.f32 1.5, %v147_v41 }
  0xbe   :  { %v136_v44 = vmul.f32 %v1250_v34, %v135_v42 }
  0xbf   :  { %v149_v45 = vmul.f32 %v1252_v35, %v148_v43 }
  0xc0   :  { %v140_v47 = vsel %vm139_vm5, %v1250_v34, %v136_v44 }
  0xc1   :  { %v141_v48 = vmul.f32 %v140_v47, %v99_v5  ;;  %v142_v49 = vmul.f32 %v140_v47, %v101_v8  ;;  %v153_v50 = vsel %vm152_vm7, %v1252_v35, %v149_v45 }
  0xc2   :  { %v154_v51 = vmul.f32 %v153_v50, %v99_v5  ;;  %v155_v52 = vmul.f32 %v153_v50, %v101_v8  ;;  %v66_v5 = vpack.c.bf16 %v64_v4, %v63_v3 }
  0xc3   :  { %v160_v53 = vmul.f32 %v1247_v46, %v141_v48  ;;  %v161_v54 = vmul.f32 %v1247_v46, %v142_v49 }
  0xc4   :  { %v164_v55 = vpack.c.bf16 %v154_v51, %v154_v51  ;;  %v165_v56 = vpack.c.bf16 %v155_v52, %v155_v52  ;;  %1207 = vmatmul.msk.bf16.gmra.mxu0 %vm83_vm0, %v66_v5 }
  0xc5   :  { %v163_v57 = vpack.c.bf16 %v161_v54, %v161_v54  ;;  %v162_v58 = vpack.c.bf16 %v160_v53, %v160_v53 }
  0xc6   :  { %v175_v59 = vunpack.c.l.b16 %v164_v55  ;;  %v176_v60 = vunpack.c.l.b16 %v165_v56 }
  0xc7   :  { %v171_v61 = vunpack.c.l.b16 %v163_v57  ;;  %v170_v62 = vunpack.c.l.b16 %v162_v58 }
  0xc8   :  { %v1486_v63 = vpack.c.b16 %v176_v60, %v175_v59 }
  0xc9   :  { %v1488_v0 = vpack.c.b16 %v171_v61, %v170_v62  ;;  %v1248_v61 = vld [vmem:[#allocation2] ss:$0 sm:$0xff] }
  0xca   :  { %178 = vrot.lane.b32.xlu0 %v1486_v63, %s1430_s2 }
  0xcb   :  { %295 = vrot.lane.b32.xlu2 %v1488_v0, %s1431_s29 }
  0xd3   :  { %297 = vrot.lane.b32.xlu2 %v1486_v63, %s1432_s30 }
  0xfc   :  { %v1496_v1 = vpop.permute.xlu2 %256 }
 0x125   :  { %v296_v2 = vpop.permute.xlu2 %295 }
 0x12d   :  { %v298_v6 = vpop.permute.xlu2 %297 }
 0x12e   :  { %v303_v7 = vsel %vm180_vm8, %v298_v6, 0 }
 0x12f   :  { %312 = vmatpush.bf16.xpose.msra.mxu3 %v303_v7 }
 0x136   :  { %1210 = vmatmul.msk.bf16.vlgmr.msra.gmra.mxu3 %vm180_vm8, %v296_v2 }
 0x13c   :  { %v179_v8 = vpop.permute.xlu0 %178 }
 0x13d   :  { %v185_v9 = vsel %vm180_vm8, %v179_v8, 0 }
 0x13e   :  { %194 = vmatpush.bf16.xpose.msra.mxu1 %v185_v9 }
 0x141   :  { %v1504_v10 = vpop.f32.mrf.mxu0 }
 0x142   :  { %v646_v11 = vmul.f32 %v1504_v10, %v1504_v10 }
 0x144   :  { %v648_v13 = vsel %vm83_vm0, %v646_v11, 0.0  ;;  %v657_v14 = vsel %vm120_vm1, %v646_v11, 0.0 }
 0x145   :  { %1208 = vmatmul.msk.bf16.vlgmr.msra.gmra.mxu1 %vm180_vm8, %v1488_v0 }
 0x149   :  { %v1508_v12 = vpop.f32.mrf.mxu0 }
 0x14a   :  { %v647_v15 = vmul.f32 %v1508_v12, %v1508_v12 }
 0x14c   :  { %v649_v16 = vsel %vm83_vm0, %v647_v15, 0.0  ;;  %v658_v17 = vsel %vm120_vm1, %v647_v15, 0.0 }
 0x14d   :  { %v650_v18 = vadd.f32 %v649_v16, %v648_v13  ;;  %v659_v20 = vadd.f32 %v658_v17, %v657_v14 }
 0x14f   :  { %v651_v23 = vrot.slane %v650_v18, 4  ;;  %v660_v24 = vrot.slane %v659_v20, 4 }
 0x151   :  { %v652_v25 = vadd.f32 %v651_v23, %v650_v18  ;;  %v661_v26 = vadd.f32 %v660_v24, %v659_v20 }
 0x153   :  { %v653_v27 = vrot.slane %v652_v25, 2  ;;  %v662_v28 = vrot.slane %v661_v26, 2 }
 0x155   :  { %v654_v29 = vadd.f32 %v653_v27, %v652_v25  ;;  %v663_v30 = vadd.f32 %v662_v28, %v661_v26 }
 0x157   :  { %v655_v32 = vrot.slane %v654_v29, 1  ;;  %v664_v33 = vrot.slane %v663_v30, 1 }
 0x159   :  { %v656_v35 = vadd.f32 %v655_v32, %v654_v29  ;;  %v665_v36 = vadd.f32 %v664_v33, %v663_v30 }
 0x15b   :  { %v666_v37 = vmax.f32 %v656_v35, 1e-24  ;;  %v679_v38 = vmax.f32 %v665_v36, 1e-24 }
 0x15d   :  { %1253 = vrsqrt.f32 %v666_v37  ;;  %vm686_vm10 = vweird.f32 %v679_v38  ;;  %vm673_vm12 = vweird.f32 %v666_v37 }
 0x15e   :  { %1255 = vrsqrt.f32 %v679_v38 }
 0x163   :  { %v1254_v41 = vpop.eup %1253 }
 0x164   :  { %v1256_v42 = vpop.eup %1255  ;;  %v668_v43 = vmul.f32 %v1254_v41, %v666_v37  ;;  %vm674_vm13 = vweird.f32 %v1254_v41 }
 0x165   :  { %v681_v44 = vmul.f32 %v1256_v42, %v679_v38  ;;  %vm687_vm11 = vweird.f32 %v1256_v42  ;;  %vm675_vm15 = vmor %vm673_vm12, %vm674_vm13 }
 0x166   :  { %v669_v45 = vmul.f32 %v1254_v41, %v668_v43  ;;  %vm688_vm14 = vmor %vm686_vm10, %vm687_vm11 }
 0x167   :  { %v682_v46 = vmul.f32 %v1256_v42, %v681_v44 }
 0x168   :  { %v670_v47 = vmul.f32 0.5, %v669_v45 }
 0x169   :  { %v683_v48 = vmul.f32 0.5, %v682_v46 }
 0x16a   :  { %v671_v49 = vsub.f32 1.5, %v670_v47 }
 0x16b   :  { %v684_v50 = vsub.f32 1.5, %v683_v48 }
 0x16c   :  { %v672_v51 = vmul.f32 %v1254_v41, %v671_v49 }
 0x16d   :  { %v685_v52 = vmul.f32 %v1256_v42, %v684_v50 }
 0x16e   :  { %v676_v56 = vsel %vm675_vm15, %v1254_v41, %v672_v51 }
 0x16f   :  { %v689_v53 = vsel %vm688_vm14, %v1256_v42, %v685_v52  ;;  %v677_v59 = vmul.f32 %v676_v56, %v1504_v10  ;;  %v678_v60 = vmul.f32 %v676_v56, %v1508_v12 }
 0x170   :  { %v690_v54 = vmul.f32 %v689_v53, %v1504_v10  ;;  %v691_v55 = vmul.f32 %v689_v53, %v1508_v12 }
 0x171   :  { %v696_v4 = vmul.f32 %v1248_v61, %v677_v59  ;;  %v697_v5 = vmul.f32 %v1248_v61, %v678_v60 }
 0x172   :  { %v700_v57 = vpack.c.bf16 %v690_v54, %v690_v54  ;;  %v701_v58 = vpack.c.bf16 %v691_v55, %v691_v55 }
 0x173   :  { %v699_v6 = vpack.c.bf16 %v697_v5, %v697_v5  ;;  %v698_v7 = vpack.c.bf16 %v696_v4, %v696_v4 }
 0x174   :  { %v711_v62 = vunpack.c.l.b16 %v700_v57  ;;  %v712_v2 = vunpack.c.l.b16 %v701_v58 }
 0x175   :  { %v707_v8 = vunpack.c.l.b16 %v699_v6  ;;  %v706_v9 = vunpack.c.l.b16 %v698_v7 }
 0x176   :  { %v713_v3 = vpack.c.b16 %v712_v2, %v711_v62 }
 0x177   :  { %v1535_v11 = vpack.c.b16 %v707_v8, %v706_v9 }
 0x1b9   :  { %v1516_v21 = vpop.f32.mrf.mxu3 }
 0x1ba   :  { %v319_v22 = vsel %vm201_vm9, %v1516_v21, -inf }
 0x1bb   :  { %320 = vmax.xlane.f32.xlu2 %v319_v22 }
 0x1c1   :  { %v1540_v13 = vpop.f32.mrf.mxu3 }
 0x1c2   :  { %v1520_v31 = vpop.f32.mrf.mxu1  ;;  %v322_v14 = vsel %vm201_vm9, %v1540_v13, -inf }
 0x1c3   :  { %v202_v34 = vsel %vm201_vm9, %v1520_v31, -inf }
 0x1c4   :  { %203 = vmax.xlane.f32.xlu0 %v202_v34 }
 0x1ca   :  { %v198_v39 = vpop.f32.mrf.mxu1 }
 0x1cb   :  { %v205_v40 = vsel %vm201_vm9, %v198_v39, -inf }
 0x1cc   :  { %206 = vmax.xlane.f32.xlu1 %v205_v40 }
 0x1d3   :  { %529 = vrot.lane.b32.xlu2 %v1488_v0, %s1433_s4 }
 0x1d8   :  { %368 = vrot.lane.b32.xlu0 %v1482_v19, %s1434_s5 }
 0x1db   :  { %832 = vrot.lane.b32.xlu2 %v713_v3, %s1432_s30 }
 0x1e3   :  { %948 = vrot.lane.b32.xlu2 %v713_v3, %s1435_s6 }
 0x1eb   :  { %830 = vrot.lane.b32.xlu2 %v1535_v11, %s1431_s29 }
 0x1f3   :  { %946 = vrot.lane.b32.xlu2 %v1535_v11, %s1436_s7 }
 0x1fb   :  { %1064 = vrot.lane.b32.xlu2 %v713_v3, %s1437_s8 }
 0x202   :  { %323 = vmax.xlane.f32.xlu0 %v322_v14 }
 0x206   :  { %259 = vxpose.xlu1.c.b16.start.end [1/1] (short) (narrow) %v1496_v1, 16 }
 0x216   :  { %412 = vrot.lane.b32.xlu0 %v1488_v0, %s1436_s7 }
 0x21e   :  { %531 = vrot.lane.b32.xlu0 %v1486_v63, %s1437_s8 }
 0x226   :  { %714 = vrot.lane.b32.xlu0 %v713_v3, %s1430_s2 }
 0x22e   :  { %1062 = vrot.lane.b32.xlu0 %v1535_v11, %s1433_s4  ;;  %v321_v18 = vpop.xlane.xlu2 %320 }
 0x22f   :  { %v325_v20 = vsub.f32 %v1516_v21, %v321_v18 }
 0x231   :  { %v327_v23 = vmul.f32 1.442695, %v325_v20 }
 0x236   :  { %v530_v29 = vpop.permute.xlu2 %529 }
 0x237   :  { %v204_v1 = vpop.xlane.xlu0 %203 }
 0x238   :  { %v208_v25 = vsub.f32 %v1520_v31, %v204_v1 }
 0x23a   :  { %v210_v27 = vmul.f32 1.442695, %v208_v25 }
 0x23e   :  { %v833_v30 = vpop.permute.xlu2 %832 }
 0x23f   :  { %v207_v15 = vpop.xlane.xlu1 %206 }
 0x240   :  { %v209_v16 = vsub.f32 %v198_v39, %v207_v15  ;;  %v838_v39 = vsel %vm180_vm8, %v833_v30, 0 }
 0x242   :  { %v212_v17 = vmul.f32 1.442695, %v209_v16 }
 0x244   :  { %1257 = vpow2.f32 %v212_v17 }
 0x245   :  { %1259 = vpow2.f32 %v327_v23 }
 0x246   :  { %1261 = vpow2.f32 %v210_v27  ;;  %v1568_v31 = vpop.permute.xlu2 %948 }
 0x247   :  { %v954_v17 = vsel %vm180_vm8, %v1568_v31, 0 }
 0x24a   :  { %v1551_v22 = vpop.eup %1257  ;;  %v1566_v32 = vpop.permute.xlu0 %368 }
 0x24b   :  { %v217_v0 = vsel %vm201_vm9, %v1551_v22, 0.0  ;;  %v1555_v24 = vpop.eup %1259 }
 0x24c   :  { %218 = vadd.xlane.f32.xlu2 %v217_v0  ;;  %v331_v26 = vsel %vm201_vm9, %v1555_v24, 0.0  ;;  %v1560_v21 = vpop.eup %1261 }
 0x24d   :  { %v214_v28 = vsel %vm201_vm9, %v1560_v21, 0.0 }
 0x24e   :  { %v831_v34 = vpop.permute.xlu2 %830 }
 0x256   :  { %v1574_v36 = vpop.permute.xlu2 %946 }
 0x258   :  { %332 = vadd.xlane.f32.xlu0 %v331_v26 }
 0x25e   :  { %v1065_v40 = vpop.permute.xlu2 %1064 }
 0x25f   :  { %v1070_v41 = vsel %vm180_vm8, %v1065_v40, 0 }
 0x264   :  { %485 = vrot.lane.b32.xlu2 %v1482_v19, %s1438_s9 }
 0x266   :  { %215 = vadd.xlane.f32.xlu1 %v214_v28 }
 0x275   :  { %v1572_v33 = vpop.xlane.xlu0 %323 }
 0x276   :  { %v326_v26 = vsub.f32 %v1540_v13, %v1572_v33 }
 0x27f   :  { %414 = vrot.lane.b32.xlu1 %v1486_v63, %s1435_s6 }
 0x288   :  { %v413_v35 = vpop.permute.xlu0 %412 }
 0x290   :  { %v532_v37 = vpop.permute.xlu0 %531 }
 0x291   :  { %v537_v38 = vsel %vm180_vm8, %v532_v37, 0 }
 0x292   :  { %546 = vmatpush.bf16.xpose.msrb.mxu0 %v537_v38 }
 0x298   :  { %v715_v63 = vpop.permute.xlu0 %714 }
 0x299   :  { %1214 = vmatmul.msk.bf16.vlgmr.msrb.gmra.mxu0 %vm180_vm8, %v530_v29  ;;  %v720_v16 = vsel %vm180_vm8, %v715_v63, 0  ;;  %v702_v63 = vpack.c.bf16 %v1504_v10, %v1504_v10 }
 0x29a   :  { %847 = vmatpush.bf16.xpose.msra.mxu0 %v838_v39 }
 0x2a0   :  { %v1063_v42 = vpop.permute.xlu0 %1062 }
 0x2a2   :  { %1079 = vmatpush.bf16.xpose.msrb.mxu0 %v1070_v41 }
 0x2a9   :  { %1218 = vmatmul.msk.bf16.vlgmr.msra.gmra.mxu0 %vm180_vm8, %v831_v34 }
 0x2b2   :  { %v267_v45 = vpop.trf.xlu1 }
 0x2b9   :  { %1222 = vmatmul.msk.bf16.vlgmr.msrb.gmra.mxu0 %vm180_vm8, %v1063_v42  ;;  %v703_v42 = vpack.c.bf16 %v1508_v12, %v1508_v12 }
 0x2bf   :  { %v219_v43 = vpop.xlane.xlu2 %218 }
 0x2c0   :  { %1263 = vrcp.f32 %v219_v43  ;;  %v246_v54 = vand.u32 2147483648, %v219_v43  ;;  %vm240_vm1 = vweird.f32 %v219_v43  ;;  %v244_v56 = vand.u32 2147483647, %v219_v43 }
 0x2c2   :  { %v247_v61 = vor.u32 1.1754944e-38, %v246_v54  ;;  %vm245_vm5 = vcmp.eq.f32.partialorder %v244_v56, 8.507059e+37 }
 0x2c6   :  { %v1264_v46 = vpop.eup %1263 }
 0x2c7   :  { %v486_v44 = vpop.permute.xlu2 %485  ;;  %v236_v47 = vmul.f32 %v1264_v46, %v219_v43  ;;  %vm241_vm0 = vweird.f32 %v1264_v46  ;;  %v787_v43 = vunpack.c.l.b16 %v702_v63 }
 0x2c8   :  { %488 = vxpose.xlu0.c.b16.start.end [1/1] (short) (narrow) %v486_v44, 16  ;;  %vm242_vm2 = vmor %vm240_vm1, %vm241_vm0  ;;  %v788_v44 = vunpack.c.l.b16 %v703_v42 }
 0x2c9   :  { %v237_v48 = vsub.f32 1.0, %v236_v47 }
 0x2cb   :  { %v238_v50 = vmul.f32 %v1264_v46, %v237_v48  ;;  %v333_v10 = vpop.xlane.xlu0 %332 }
 0x2cc   :  { %vm342_vm10 = vweird.f32 %v333_v10 }
 0x2cd   :  { %v239_v53 = vadd.f32 %v1264_v46, %v238_v50 }
 0x2cf   :  { %v243_v60 = vsel %vm242_vm2, %v1264_v46, %v239_v53 }
 0x2d0   :  { %v248_v3 = vsel %vm245_vm5, %v247_v61, %v243_v60  ;;  %v348_v60 = vand.u32 2147483648, %v333_v10 }
 0x2d1   :  { %v249_v7 = vmul.f32 %v1551_v22, %v248_v3 }
 0x2d9   :  { %v216_v49 = vpop.xlane.xlu1 %215 }
 0x2da   :  { %1265 = vrcp.f32 %v216_v49  ;;  %v231_v57 = vand.u32 2147483648, %v216_v49  ;;  %v229_v59 = vand.u32 2147483647, %v216_v49  ;;  %vm225_vm4 = vweird.f32 %v216_v49 }
 0x2dc   :  { %v232_v2 = vor.u32 1.1754944e-38, %v231_v57  ;;  %vm230_vm7 = vcmp.eq.f32.partialorder %v229_v59, 8.507059e+37 }
 0x2e0   :  { %v1266_v51 = vpop.eup %1265 }
 0x2e1   :  { %v221_v52 = vmul.f32 %v1266_v51, %v216_v49  ;;  %vm226_vm3 = vweird.f32 %v1266_v51 }
 0x2e2   :  { %vm227_vm6 = vmor %vm225_vm4, %vm226_vm3 }
 0x2e3   :  { %v222_v55 = vsub.f32 1.0, %v221_v52 }
 0x2e5   :  { %v223_v58 = vmul.f32 %v1266_v51, %v222_v55 }
 0x2e7   :  { %v224_v62 = vadd.f32 %v1266_v51, %v223_v58 }
 0x2e9   :  { %v228_v4 = vsel %vm227_vm6, %v1266_v51, %v224_v62  ;;  %v346_v62 = vand.u32 2147483647, %v333_v10 }
 0x2ea   :  { %v233_v5 = vsel %vm230_vm7, %v232_v2, %v228_v4 }
 0x2eb   :  { %v234_v6 = vmul.f32 %v1560_v21, %v233_v5  ;;  %v329_v21 = vmul.f32 1.442695, %v326_v26  ;;  %vm1648_vm12 = vcmp.eq.f32.partialorder %v346_v62, 8.507059e+37 }
 0x2ed   :  { %v250_v8 = vpack.c.bf16 %v249_v7, %v234_v6  ;;  %v349_v6 = vor.u32 1.1754944e-38, %v348_v60 }
 0x2ef   :  { %v279_v9 = vsel %vm201_vm9, %v250_v8, 0 }
 0x2f0   :  { %288 = vmatpush.bf16.xpose.msra.mxu2 %v279_v9 }
 0x2f1   :  { %v415_v14 = vpop.permute.xlu1 %414 }
 0x2f2   :  { %v420_v15 = vsel %vm180_vm8, %v415_v14, 0 }
 0x2f7   :  { %1209 = vmatmul.msk.bf16.vlgmr.msra.gmra.mxu2 %vm201_vm9, %v267_v45  ;;  %v1628_v45 = vpack.c.b16 %v788_v44, %v787_v43 }
 0x2f8   :  { %429 = vmatpush.bf16.xpose.msrb.mxu2 %v420_v15 }
 0x300   :  { %729 = vmatpush.bf16.xpose.msra.mxu2 %v720_v16 }
 0x307   :  { %1212 = vmatmul.msk.bf16.vlgmr.msrb.gmra.mxu2 %vm180_vm8, %v413_v35 }
 0x308   :  { %963 = vmatpush.bf16.xpose.msrb.mxu2 %v954_v17 }
 0x316   :  { %v548_v18 = vpop.f32.mrf.mxu0 }
 0x317   :  { %1216 = vmatmul.msk.bf16.vlgmr.msra.gmra.mxu2 %vm180_vm8, %v1535_v11  ;;  %v553_v20 = vsel %vm201_vm9, %v548_v18, -inf }
 0x318   :  { %554 = vmax.xlane.f32.xlu2 %v553_v20 }
 0x31e   :  { %v550_v22 = vpop.f32.mrf.mxu0 }
 0x31f   :  { %v556_v23 = vsel %vm201_vm9, %v550_v22, -inf }
 0x320   :  { %557 = vmax.xlane.f32.xlu1 %v556_v23 }
 0x326   :  { %v1607_v34 = vpop.f32.mrf.mxu0 }
 0x327   :  { %1220 = vmatmul.msk.bf16.vlgmr.msrb.gmra.mxu2 %vm180_vm8, %v1574_v36 }
 0x32e   :  { %v1617_v37 = vpop.f32.mrf.mxu0 }
 0x32f   :  { %v857_v62 = vsel %vm201_vm9, %v1617_v37, -inf }
 0x330   :  { %602 = vrot.lane.b32.xlu2 %v1482_v19, %s1439_s10 }
 0x336   :  { %v1620_v40 = vpop.f32.mrf.mxu0 }
 0x337   :  { %v1086_v41 = vsel %vm201_vm9, %v1620_v40, -inf }
 0x35a   :  { %371 = vxpose.xlu1.c.b16.start.end [1/1] (short) (narrow) %v1566_v32, 16 }
 0x374   :  { %v1640_v50 = vpop.trf.xlu0 }
 0x37a   :  { %v290_v0 = vpop.f32.mrf.mxu2 }
 0x37b   :  { %294 = vst.msk [vmem:[#allocation8] sm:$0xff] %vm201_vm9, %v290_v0 }
 0x382   :  { %v292_v11 = vpop.f32.mrf.mxu2 }
 0x38a   :  { %v431_v38 = vpop.f32.mrf.mxu2 }
 0x38b   :  { %v555_v1 = vpop.xlane.xlu2 %554  ;;  %v436_v39 = vsel %vm201_vm9, %v431_v38, -inf }
 0x38c   :  { %v559_v25 = vsub.f32 %v548_v18, %v555_v1 }
 0x38e   :  { %v561_v27 = vmul.f32 1.442695, %v559_v25 }
 0x390   :  { %1267 = vpow2.f32 %v561_v27 }
 0x391   :  { %1269 = vpow2.f32 %v329_v21 }
 0x392   :  { %v1632_v46 = vpop.f32.mrf.mxu2 }
 0x393   :  { %v603_v28 = vpop.permute.xlu2 %602  ;;  %v558_v29 = vpop.xlane.xlu1 %557 }
 0x394   :  { %v560_v30 = vsub.f32 %v550_v22, %v558_v29  ;;  %605 = vxpose.xlu1.c.b16.start.end [1/1] (short) (narrow) %v603_v28, 16 }
 0x396   :  { %v1603_v31 = vpop.eup %1267  ;;  %v563_v19 = vmul.f32 1.442695, %v560_v30 }
 0x397   :  { %v565_v32 = vsel %vm201_vm9, %v1603_v31, 0.0  ;;  %v1609_v35 = vpop.eup %1269 }
 0x398   :  { %1271 = vpow2.f32 %v563_v19  ;;  %566 = vadd.xlane.f32.xlu0 %v565_v32  ;;  %v334_v33 = vsel %vm201_vm9, %v1609_v35, 0.0 }
 0x399   :  { %1273 = vrcp.f32 %v333_v10 }
 0x39a   :  { %v1634_v47 = vpop.f32.mrf.mxu2 }
 0x39b   :  { %v736_v60 = vsel %vm201_vm9, %v1634_v47, -inf }
 0x39e   :  { %v1611_v13 = vpop.eup %1271 }
 0x39f   :  { %v568_v36 = vsel %vm201_vm9, %v1611_v13, 0.0  ;;  %v1274_v12 = vpop.eup %1273 }
 0x3a0   :  { %335 = vadd.xlane.f32.xlu0 %v334_v33  ;;  %569 = vadd.xlane.f32.xlu2 %v568_v36  ;;  %v338_v51 = vmul.f32 %v1274_v12, %v333_v10  ;;  %vm343_vm8 = vweird.f32 %v1274_v12 }
 0x3a1   :  { %vm1642_vm11 = vmor %vm342_vm10, %vm343_vm8  ;;  %vm410_vm10 = vcmask 261248  }
 0x3a2   :  { %v1636_v48 = vpop.f32.mrf.mxu2  ;;  %v339_v53 = vsub.f32 1.0, %v338_v51 }
 0x3a3   :  { %v739_v49 = vsel %vm201_vm9, %v1636_v48, -inf }
 0x3a4   :  { %v340_v55 = vmul.f32 %v1274_v12, %v339_v53 }
 0x3a6   :  { %v341_v61 = vadd.f32 %v1274_v12, %v340_v55 }
 0x3a8   :  { %437 = vmax.xlane.f32.xlu0 %v436_v39  ;;  %v345_v9 = vsel %vm1642_vm11, %v1274_v12, %v341_v61  ;;  %v854_v61 = vsel %vm201_vm9, %v1607_v34, -inf }
 0x3a9   :  { %v350_v19 = vsel %vm1648_vm12, %v349_v6, %v345_v9 }
 0x3aa   :  { %v351_v43 = vmul.f32 %v1555_v24, %v350_v19 }
 0x3b0   :  { %1087 = vmax.xlane.f32.xlu0 %v1086_v41 }
 0x3c4   :  { %790 = vrot.lane.b32.xlu0 %v1628_v45, %s1428_s0 }
 0x3f4   :  { %740 = vmax.xlane.f32.xlu1 %v739_v49 }
 0x40b   :  { %v567_v52 = vpop.xlane.xlu0 %566 }
 0x40c   :  { %1275 = vrcp.f32 %v567_v52  ;;  %vm576_vm14 = vweird.f32 %v567_v52  ;;  %v580_v18 = vand.u32 2147483647, %v567_v52  ;;  %v582_v20 = vand.u32 2147483648, %v567_v52 }
 0x40e   :  { %v583_v30 = vor.u32 1.1754944e-38, %v582_v20  ;;  %vm581_vm3 = vcmp.eq.f32.partialorder %v580_v18, 8.507059e+37 }
 0x412   :  { %v1276_v54 = vpop.eup %1275 }
 0x413   :  { %v572_v56 = vmul.f32 %v1276_v54, %v567_v52  ;;  %v336_v57 = vpop.xlane.xlu0 %335  ;;  %v570_v58 = vpop.xlane.xlu2 %569  ;;  %vm577_vm13 = vweird.f32 %v1276_v54 }
 0x414   :  { %1277 = vrcp.f32 %v336_v57  ;;  %v363_v23 = vand.u32 2147483648, %v336_v57  ;;  %v595_v11 = vand.u32 2147483647, %v570_v58  ;;  %vm1652_vm15 = vmor %vm576_vm14, %vm577_vm13  ;;  %v597_v27 = vand.u32 2147483648, %v570_v58 }
 0x415   :  { %v573_v59 = vsub.f32 1.0, %v572_v56  ;;  %1279 = vrcp.f32 %v570_v58  ;;  %v361_v21 = vand.u32 2147483647, %v336_v57  ;;  %vm357_vm2 = vweird.f32 %v336_v57 }
 0x416   :  { %v364_v33 = vor.u32 1.1754944e-38, %v363_v23  ;;  %vm591_vm5 = vweird.f32 %v570_v58  ;;  %vm596_vm8 = vcmp.eq.f32.partialorder %v595_v11, 8.507059e+37 }
 0x417   :  { %v574_v2 = vmul.f32 %v1276_v54, %v573_v59  ;;  %vm362_vm7 = vcmp.eq.f32.partialorder %v361_v21, 8.507059e+37  ;;  %v439_v59 = vsel %vm201_vm9, %v1632_v46, -inf }
 0x419   :  { %v575_v15 = vadd.f32 %v1276_v54, %v574_v2  ;;  %v1083_v2 = vpop.f32.mrf.mxu0 }
 0x41a   :  { %v1278_v3 = vpop.eup %1277 }
 0x41b   :  { %v1280_v5 = vpop.eup %1279  ;;  %v353_v7 = vmul.f32 %v1278_v3, %v336_v57  ;;  %v438_v8 = vpop.xlane.xlu0 %437  ;;  %vm358_vm0 = vweird.f32 %v1278_v3  ;;  %v579_v29 = vsel %vm1652_vm15, %v1276_v54, %v575_v15 }
 0x41c   :  { %v587_v16 = vmul.f32 %v1280_v5, %v570_v58  ;;  %v442_v17 = vsub.f32 %v431_v38, %v438_v8  ;;  %vm592_vm1 = vweird.f32 %v1280_v5  ;;  %vm359_vm4 = vmor %vm357_vm2, %vm358_vm0  ;;  %v598_v38 = vor.u32 1.1754944e-38, %v597_v27  ;;  %v1708_v27 = vpop.f32.mrf.mxu2 }
 0x41d   :  { %v354_v22 = vsub.f32 1.0, %v353_v7  ;;  %vm593_vm6 = vmor %vm591_vm5, %vm592_vm1  ;;  %v584_v41 = vsel %vm581_vm3, %v583_v30, %v579_v29 }
 0x41e   :  { %v588_v0 = vsub.f32 1.0, %v587_v16  ;;  %v444_v1 = vmul.f32 1.442695, %v442_v17  ;;  %v585_v12 = vmul.f32 %v1603_v31, %v584_v41 }
 0x41f   :  { %v355_v26 = vmul.f32 %v1278_v3, %v354_v22 }
 0x420   :  { %v589_v28 = vmul.f32 %v1280_v5, %v588_v0  ;;  %1281 = vpow2.f32 %v444_v1 }
 0x421   :  { %v356_v32 = vadd.f32 %v1278_v3, %v355_v26 }
 0x422   :  { %v590_v36 = vadd.f32 %v1280_v5, %v589_v28  ;;  %v970_v28 = vsel %vm201_vm9, %v1708_v27, -inf }
 0x423   :  { %v360_v39 = vsel %vm359_vm4, %v1278_v3, %v356_v32  ;;  %v1089_v3 = vsel %vm201_vm9, %v1083_v2, -inf }
 0x424   :  { %v365_v63 = vsel %vm362_vm7, %v364_v33, %v360_v39  ;;  %v594_v42 = vsel %vm593_vm6, %v1280_v5, %v590_v36  ;;  %v1715_v19 = vpop.f32.mrf.mxu2 }
 0x425   :  { %v366_v44 = vmul.f32 %v1609_v35, %v365_v63  ;;  %v599_v49 = vsel %vm596_vm8, %v598_v38, %v594_v42  ;;  %v379_v35 = vpop.trf.xlu1  ;;  %v973_v33 = vsel %vm201_vm9, %v1715_v19, -inf }
 0x426   :  { %v1662_v10 = vpop.eup %1281  ;;  %v600_v51 = vmul.f32 %v1611_v13, %v599_v49 }
 0x427   :  { %v448_v52 = vsel %vm201_vm9, %v1662_v10, 0.0  ;;  %v367_v53 = vpack.c.bf16 %v366_v44, %v351_v43 }
 0x428   :  { %449 = vadd.xlane.f32.xlu0 %v448_v52  ;;  %v601_v54 = vpack.c.bf16 %v600_v51, %v585_v12 }
 0x429   :  { %v391_v55 = vsel %vm201_vm9, %v367_v53, 0 }
 0x42a   :  { %400 = vmatpush.bf16.xpose.msrb.mxu1 %v391_v55  ;;  %v625_v24 = vsel %vm201_vm9, %v601_v54, 0 }
 0x431   :  { %1211 = vmatmul.msk.bf16.vlgmr.msrb.gmra.mxu1 %vm201_vm9, %v379_v35 }
 0x432   :  { %634 = vmatpush.bf16.xpose.msra.mxu1 %v625_v24 }
 0x440   :  { %v613_v56 = vpop.trf.xlu1 }
 0x441   :  { %1215 = vmatmul.msk.bf16.vlgmr.msra.gmra.mxu1 %vm201_vm9, %v613_v56 }
 0x467   :  { %v741_v42 = vpop.xlane.xlu1 %740 }
 0x468   :  { %v743_v44 = vsub.f32 %v1636_v48, %v741_v42 }
 0x46a   :  { %v746_v49 = vmul.f32 1.442695, %v743_v44 }
 0x4ae   :  { %v402_v31 = vpop.f32.mrf.mxu1 }
 0x4af   :  { %407 = vrot.lane.b32.xlu2 %v402_v31, %s1440_s11 }
 0x4b6   :  { %v404_v13 = vpop.f32.mrf.mxu1 }
 0x4be   :  { %v636_v57 = vpop.f32.mrf.mxu1 }
 0x4bf   :  { %641 = vrot.lane.b32.xlu2 %v636_v57, %s1438_s9 }
 0x4c6   :  { %v638_v58 = vpop.f32.mrf.mxu1 }
 0x4e8   :  { %440 = vmax.xlane.f32.xlu2 %v439_v59 }
 0x4f0   :  { %737 = vmax.xlane.f32.xlu2 %v736_v60 }
 0x4f8   :  { %855 = vmax.xlane.f32.xlu2 %v854_v61 }
 0x500   :  { %858 = vmax.xlane.f32.xlu2 %v857_v62 }
 0x508   :  { %1090 = vmax.xlane.f32.xlu2 %v1089_v3 }
 0x509   :  { %v408_v4 = vpop.permute.xlu2 %407 }
 0x50a   :  { %411 = vst.msk [vmem:[#allocation8] sm:$0xff] %vm410_vm10, %v408_v4 }
 0x519   :  { %v1684_v5 = vpop.permute.xlu2 %641 }
 0x55b   :  { %v441_v6 = vpop.xlane.xlu2 %440 }
 0x55c   :  { %v443_v7 = vsub.f32 %v1632_v46, %v441_v6 }
 0x55e   :  { %v446_v8 = vmul.f32 1.442695, %v443_v7 }
 0x560   :  { %1283 = vpow2.f32 %v446_v8 }
 0x563   :  { %v738_v9 = vpop.xlane.xlu2 %737 }
 0x564   :  { %v742_v14 = vsub.f32 %v1634_v47, %v738_v9 }
 0x566   :  { %v1688_v15 = vpop.eup %1283  ;;  %v744_v16 = vmul.f32 1.442695, %v742_v14 }
 0x567   :  { %v451_v17 = vsel %vm201_vm9, %v1688_v15, 0.0 }
 0x568   :  { %1285 = vpow2.f32 %v744_v16  ;;  %452 = vadd.xlane.f32.xlu1 %v451_v17 }
 0x56b   :  { %v856_v18 = vpop.xlane.xlu2 %855 }
 0x56c   :  { %v860_v20 = vsub.f32 %v1607_v34, %v856_v18 }
 0x56e   :  { %v1693_v22 = vpop.eup %1285  ;;  %v862_v23 = vmul.f32 1.442695, %v860_v20 }
 0x56f   :  { %v748_v46 = vsel %vm201_vm9, %v1693_v22, 0.0 }
 0x570   :  { %1287 = vpow2.f32 %v862_v23  ;;  %749 = vadd.xlane.f32.xlu0 %v748_v46 }
 0x573   :  { %v859_v47 = vpop.xlane.xlu2 %858 }
 0x574   :  { %v861_v0 = vsub.f32 %v1617_v37, %v859_v47  ;;  %v1088_v37 = vpop.xlane.xlu0 %1087 }
 0x575   :  { %v1092_v21 = vsub.f32 %v1620_v40, %v1088_v37 }
 0x576   :  { %v1698_v11 = vpop.eup %1287  ;;  %v864_v1 = vmul.f32 1.442695, %v861_v0 }
 0x577   :  { %v866_v25 = vsel %vm201_vm9, %v1698_v11, 0.0  ;;  %v1094_v29 = vmul.f32 1.442695, %v1092_v21 }
 0x578   :  { %1289 = vpow2.f32 %v864_v1  ;;  %867 = vadd.xlane.f32.xlu2 %v866_v25 }
 0x579   :  { %1291 = vpow2.f32 %v1094_v29 }
 0x57b   :  { %v1091_v30 = vpop.xlane.xlu2 %1090 }
 0x57c   :  { %v1093_v32 = vsub.f32 %v1083_v2, %v1091_v30  ;;  %v1729_v63 = vpop.permute.xlu0 %790 }
 0x57e   :  { %v1702_v34 = vpop.eup %1289  ;;  %v1096_v36 = vmul.f32 1.442695, %v1093_v32 }
 0x57f   :  { %v869_v26 = vsel %vm201_vm9, %v1702_v34, 0.0  ;;  %v1719_v38 = vpop.eup %1291 }
 0x580   :  { %870 = vadd.xlane.f32.xlu2 %v869_v26  ;;  %1293 = vpow2.f32 %v1096_v36  ;;  %v1098_v40 = vsel %vm201_vm9, %v1719_v38, 0.0 }
 0x581   :  { %1135 = vrot.lane.b32.xlu1 %v1628_v45, %s1439_s10 }
 0x584   :  { %903 = vrot.lane.b32.xlu0 %v1628_v45, %s1434_s5  ;;  %v450_v43 = vpop.xlane.xlu0 %449 }
 0x585   :  { %1295 = vrcp.f32 %v450_v43  ;;  %v465_v48 = vand.u32 2147483648, %v450_v43  ;;  %vm459_vm12 = vweird.f32 %v450_v43  ;;  %v463_v13 = vand.u32 2147483647, %v450_v43 }
 0x586   :  { %v1723_v39 = vpop.eup %1293  ;;  %1297 = vpow2.f32 %v746_v49 }
 0x587   :  { %v1101_v41 = vsel %vm201_vm9, %v1723_v39, 0.0  ;;  %v466_v61 = vor.u32 1.1754944e-38, %v465_v48  ;;  %vm464_vm1 = vcmp.eq.f32.partialorder %v463_v13, 8.507059e+37 }
 0x588   :  { %971 = vmax.xlane.f32.xlu2 %v970_v28 }
 0x58b   :  { %v1296_v12 = vpop.eup %1295 }
 0x58c   :  { %v455_v51 = vmul.f32 %v1296_v12, %v450_v43  ;;  %v1732_v54 = vpop.eup %1297  ;;  %vm460_vm11 = vweird.f32 %v1296_v12 }
 0x58d   :  { %vm461_vm13 = vmor %vm459_vm12, %vm460_vm11 }
 0x58e   :  { %v456_v53 = vsub.f32 1.0, %v455_v51 }
 0x590   :  { %974 = vmax.xlane.f32.xlu2 %v973_v33  ;;  %v457_v55 = vmul.f32 %v1296_v12, %v456_v53 }
 0x592   :  { %v458_v56 = vadd.f32 %v1296_v12, %v457_v55 }
 0x594   :  { %v462_v59 = vsel %vm461_vm13, %v1296_v12, %v458_v56 }
 0x595   :  { %v467_v4 = vsel %vm464_vm1, %v466_v61, %v462_v59 }
 0x596   :  { %v468_v8 = vmul.f32 %v1662_v10, %v467_v4 }
 0x598   :  { %1099 = vadd.xlane.f32.xlu2 %v1098_v40 }
 0x5a0   :  { %1102 = vadd.xlane.f32.xlu2 %v1101_v41 }
 0x5b8   :  { %1019 = vrot.lane.b32.xlu2 %v1628_v45, %s1438_s9  ;;  %v751_v45 = vsel %vm201_vm9, %v1732_v54, 0.0 }
 0x5db   :  { %v453_v52 = vpop.xlane.xlu1 %452 }
 0x5dc   :  { %1299 = vrcp.f32 %v453_v52  ;;  %v480_v58 = vand.u32 2147483648, %v453_v52  ;;  %v478_v60 = vand.u32 2147483647, %v453_v52  ;;  %vm474_vm15 = vweird.f32 %v453_v52 }
 0x5de   :  { %v481_v2 = vor.u32 1.1754944e-38, %v480_v58  ;;  %vm479_vm2 = vcmp.eq.f32.partialorder %v478_v60, 8.507059e+37 }
 0x5e1   :  { %752 = vadd.xlane.f32.xlu2 %v751_v45 }
 0x5e2   :  { %v1300_v24 = vpop.eup %1299 }
 0x5e3   :  { %v470_v35 = vmul.f32 %v1300_v24, %v453_v52  ;;  %vm475_vm14 = vweird.f32 %v1300_v24 }
 0x5e4   :  { %vm476_vm0 = vmor %vm474_vm15, %vm475_vm14 }
 0x5e5   :  { %v471_v31 = vsub.f32 1.0, %v470_v35 }
 0x5e7   :  { %v472_v57 = vmul.f32 %v1300_v24, %v471_v31 }
 0x5e9   :  { %v473_v62 = vadd.f32 %v1300_v24, %v472_v57 }
 0x5eb   :  { %v868_v3 = vpop.xlane.xlu2 %867  ;;  %v477_v6 = vsel %vm476_vm0, %v1300_v24, %v473_v62 }
 0x5ec   :  { %1301 = vrcp.f32 %v868_v3  ;;  %v482_v7 = vsel %vm479_vm2, %v481_v2, %v477_v6  ;;  %v883_v25 = vand.u32 2147483648, %v868_v3  ;;  %vm877_vm4 = vweird.f32 %v868_v3 }
 0x5ed   :  { %v483_v9 = vmul.f32 %v1688_v15, %v482_v7  ;;  %v881_v26 = vand.u32 2147483647, %v868_v3 }
 0x5ee   :  { %v884_v33 = vor.u32 1.1754944e-38, %v883_v25 }
 0x5ef   :  { %v484_v14 = vpack.c.bf16 %v483_v9, %v468_v8  ;;  %vm882_vm7 = vcmp.eq.f32.partialorder %v881_v26, 8.507059e+37 }
 0x5f1   :  { %v508_v17 = vsel %vm201_vm9, %v484_v14, 0 }
 0x5f2   :  { %v1302_v16 = vpop.eup %1301  ;;  %517 = vmatpush.bf16.xpose.msrb.mxu3 %v508_v17 }
 0x5f3   :  { %v873_v18 = vmul.f32 %v1302_v16, %v868_v3  ;;  %v871_v20 = vpop.xlane.xlu2 %870  ;;  %vm878_vm3 = vweird.f32 %v1302_v16 }
 0x5f4   :  { %1303 = vrcp.f32 %v871_v20  ;;  %vm879_vm5 = vmor %vm877_vm4, %vm878_vm3  ;;  %v898_v21 = vand.u32 2147483648, %v871_v20  ;;  %v896_v30 = vand.u32 2147483647, %v871_v20  ;;  %vm892_vm8 = vweird.f32 %v871_v20 }
 0x5f5   :  { %v874_v23 = vsub.f32 1.0, %v873_v18 }
 0x5f6   :  { %v899_v36 = vor.u32 1.1754944e-38, %v898_v21  ;;  %vm897_vm12 = vcmp.eq.f32.partialorder %v896_v30, 8.507059e+37 }
 0x5f7   :  { %v875_v46 = vmul.f32 %v1302_v16, %v874_v23 }
 0x5f9   :  { %1213 = vmatmul.msk.bf16.vlgmr.msrb.gmra.mxu3 %vm201_vm9, %v1640_v50  ;;  %v876_v0 = vadd.f32 %v1302_v16, %v875_v46  ;;  %v750_v46 = vpop.xlane.xlu0 %749 }
 0x5fa   :  { %v1304_v47 = vpop.eup %1303  ;;  %v765_v21 = vand.u32 2147483648, %v750_v46 }
 0x5fb   :  { %v888_v1 = vmul.f32 %v1304_v47, %v871_v20  ;;  %v972_v10 = vpop.xlane.xlu2 %971  ;;  %vm893_vm6 = vweird.f32 %v1304_v47  ;;  %v880_v32 = vsel %vm879_vm5, %v1302_v16, %v876_v0  ;;  %v1136_v0 = vpop.permute.xlu1 %1135 }
 0x5fc   :  { %v976_v15 = vsub.f32 %v1708_v27, %v972_v10  ;;  %vm894_vm11 = vmor %vm892_vm8, %vm893_vm6  ;;  %v885_v40 = vsel %vm882_vm7, %v884_v33, %v880_v32  ;;  %vm759_vm6 = vweird.f32 %v750_v46 }
 0x5fd   :  { %v889_v37 = vsub.f32 1.0, %v888_v1  ;;  %v886_v44 = vmul.f32 %v1698_v11, %v885_v40 }
 0x5fe   :  { %v978_v28 = vmul.f32 1.442695, %v976_v15 }
 0x5ff   :  { %v890_v29 = vmul.f32 %v1304_v47, %v889_v37 }
 0x600   :  { %1305 = vpow2.f32 %v978_v28  ;;  %v763_v28 = vand.u32 2147483647, %v750_v46 }
 0x601   :  { %v891_v50 = vadd.f32 %v1304_v47, %v890_v29 }
 0x603   :  { %v975_v27 = vpop.xlane.xlu2 %974  ;;  %v895_v41 = vsel %vm894_vm11, %v1304_v47, %v891_v50  ;;  %v904_v47 = vpop.permute.xlu0 %903  ;;  %v766_v50 = vor.u32 1.1754944e-38, %v765_v21  ;;  %vm764_vm11 = vcmp.eq.f32.partialorder %v763_v28, 8.507059e+37 }
 0x604   :  { %v977_v42 = vsub.f32 %v1715_v19, %v975_v27  ;;  %v900_v43 = vsel %vm897_vm12, %v899_v36, %v895_v41 }
 0x605   :  { %v901_v49 = vmul.f32 %v1702_v34, %v900_v43 }
 0x606   :  { %v1745_v12 = vpop.eup %1305  ;;  %v980_v51 = vmul.f32 1.442695, %v977_v42 }
 0x607   :  { %v982_v52 = vsel %vm201_vm9, %v1745_v12, 0.0  ;;  %v902_v53 = vpack.c.bf16 %v901_v49, %v886_v44 }
 0x608   :  { %1307 = vpow2.f32 %v980_v51  ;;  %983 = vadd.xlane.f32.xlu2 %v982_v52 }
 0x609   :  { %v926_v55 = vsel %vm201_vm9, %v902_v53, 0 }
 0x60a   :  { %935 = vmatpush.bf16.xpose.msrb.mxu1 %v926_v55 }
 0x60b   :  { %v1100_v45 = vpop.xlane.xlu2 %1099 }
 0x60c   :  { %1309 = vrcp.f32 %v1100_v45  ;;  %v1115_v59 = vand.u32 2147483648, %v1100_v45  ;;  %vm1109_vm14 = vweird.f32 %v1100_v45  ;;  %v1113_v60 = vand.u32 2147483647, %v1100_v45 }
 0x60e   :  { %v1750_v19 = vpop.eup %1307  ;;  %v1116_v6 = vor.u32 1.1754944e-38, %v1115_v59  ;;  %vm1114_vm1 = vcmp.eq.f32.partialorder %v1113_v60, 8.507059e+37 }
 0x60f   :  { %v985_v11 = vsel %vm201_vm9, %v1750_v19, 0.0 }
 0x610   :  { %986 = vadd.xlane.f32.xlu0 %v985_v11 }
 0x612   :  { %v1310_v34 = vpop.eup %1309 }
 0x613   :  { %v1105_v24 = vmul.f32 %v1310_v34, %v1100_v45  ;;  %v1103_v35 = vpop.xlane.xlu2 %1102  ;;  %vm1110_vm13 = vweird.f32 %v1310_v34 }
 0x614   :  { %1311 = vrcp.f32 %v1103_v35  ;;  %vm1111_vm15 = vmor %vm1109_vm14, %vm1110_vm13  ;;  %v1130_v62 = vand.u32 2147483648, %v1103_v35  ;;  %v1128_v3 = vand.u32 2147483647, %v1103_v35  ;;  %vm1124_vm2 = vweird.f32 %v1103_v35 }
 0x615   :  { %v1106_v56 = vsub.f32 1.0, %v1105_v24  ;;  %1313 = vrcp.f32 %v750_v46 }
 0x616   :  { %v1131_v8 = vor.u32 1.1754944e-38, %v1130_v62  ;;  %vm1129_vm4 = vcmp.eq.f32.partialorder %v1128_v3, 8.507059e+37 }
 0x617   :  { %v1107_v48 = vmul.f32 %v1310_v34, %v1106_v56 }
 0x619   :  { %v1108_v13 = vadd.f32 %v1310_v34, %v1107_v48 }
 0x61a   :  { %v1312_v31 = vpop.eup %1311 }
 0x61b   :  { %v1120_v57 = vmul.f32 %v1312_v31, %v1103_v35  ;;  %v1020_v58 = vpop.permute.xlu2 %1019  ;;  %vm1125_vm0 = vweird.f32 %v1312_v31  ;;  %v1112_v4 = vsel %vm1111_vm15, %v1310_v34, %v1108_v13  ;;  %v1314_v1 = vpop.eup %1313 }
 0x61c   :  { %1022 = vxpose.xlu1.c.b16.start.end [1/1] (short) (narrow) %v1020_v58, 16  ;;  %vm1126_vm3 = vmor %vm1124_vm2, %vm1125_vm0  ;;  %v1117_v9 = vsel %vm1114_vm1, %v1116_v6, %v1112_v4  ;;  %v755_v10 = vmul.f32 %v1314_v1, %v750_v46  ;;  %vm760_vm5 = vweird.f32 %v1314_v1 }
 0x61d   :  { %v1121_v61 = vsub.f32 1.0, %v1120_v57  ;;  %v1118_v17 = vmul.f32 %v1719_v38, %v1117_v9  ;;  %vm761_vm7 = vmor %vm759_vm6, %vm760_vm5 }
 0x61e   :  { %v756_v25 = vsub.f32 1.0, %v755_v10 }
 0x61f   :  { %v1122_v2 = vmul.f32 %v1312_v31, %v1121_v61 }
 0x620   :  { %v757_v38 = vmul.f32 %v1314_v1, %v756_v25 }
 0x621   :  { %v1123_v7 = vadd.f32 %v1312_v31, %v1122_v2 }
 0x623   :  { %v1127_v14 = vsel %vm1126_vm3, %v1312_v31, %v1123_v7 }
 0x624   :  { %v1132_v16 = vsel %vm1129_vm4, %v1131_v8, %v1127_v14 }
 0x625   :  { %v1133_v18 = vmul.f32 %v1723_v39, %v1132_v16  ;;  %v758_v39 = vadd.f32 %v1314_v1, %v757_v38 }
 0x627   :  { %v1134_v20 = vpack.c.bf16 %v1133_v18, %v1118_v17  ;;  %v762_v33 = vsel %vm761_vm7, %v1314_v1, %v758_v39  ;;  %vm527_vm7 = vcmask 392448  }
 0x628   :  { %v767_v27 = vsel %vm764_vm11, %v766_v50, %v762_v33 }
 0x629   :  { %v1158_v23 = vsel %vm201_vm9, %v1134_v20, 0  ;;  %v768_v43 = vmul.f32 %v1693_v22, %v767_v27 }
 0x62a   :  { %1167 = vmatpush.bf16.xpose.msra.mxu1 %v1158_v23 }
 0x631   :  { %793 = vxpose.xlu2.c.b16.start.end [1/1] (short) (narrow) %v1729_v63, 16 }
 0x639   :  { %906 = vxpose.xlu0.c.b16.start.end [1/1] (short) (narrow) %v904_v47, 16 }
 0x641   :  { %1138 = vxpose.xlu2.c.b16.start.end [1/1] (short) (narrow) %v1136_v0, 16 }
 0x654   :  { %v753_v15 = vpop.xlane.xlu2 %752 }
 0x655   :  { %1315 = vrcp.f32 %v753_v15  ;;  %v780_v63 = vand.u32 2147483648, %v753_v15  ;;  %v778_v32 = vand.u32 2147483647, %v753_v15  ;;  %vm774_vm12 = vweird.f32 %v753_v15 }
 0x657   :  { %v781_v40 = vor.u32 1.1754944e-38, %v780_v63  ;;  %vm779_vm14 = vcmp.eq.f32.partialorder %v778_v32, 8.507059e+37 }
 0x65b   :  { %v1316_v26 = vpop.eup %1315 }
 0x65c   :  { %v770_v37 = vmul.f32 %v1316_v26, %v753_v15  ;;  %vm775_vm8 = vweird.f32 %v1316_v26 }
 0x65d   :  { %vm776_vm13 = vmor %vm774_vm12, %vm775_vm8  ;;  %vm644_vm8 = vcmask 523648  }
 0x65e   :  { %v771_v29 = vsub.f32 1.0, %v770_v37 }
 0x660   :  { %v772_v30 = vmul.f32 %v1316_v26, %v771_v29 }
 0x662   :  { %v773_v36 = vadd.f32 %v1316_v26, %v772_v30 }
 0x664   :  { %v777_v41 = vsel %vm776_vm13, %v1316_v26, %v773_v36 }
 0x665   :  { %v782_v42 = vsel %vm779_vm14, %v781_v40, %v777_v41 }
 0x666   :  { %v783_v44 = vmul.f32 %v1732_v54, %v782_v42 }
 0x668   :  { %v784_v49 = vpack.c.bf16 %v783_v44, %v768_v43 }
 0x66a   :  { %v813_v51 = vsel %vm201_vm9, %v784_v49, 0 }
 0x66b   :  { %822 = vmatpush.bf16.xpose.msra.mxu3 %v813_v51 }
 0x67b   :  { %v984_v52 = vpop.xlane.xlu2 %983 }
 0x67c   :  { %1317 = vrcp.f32 %v984_v52  ;;  %v519_v53 = vpop.f32.mrf.mxu3  ;;  %v999_v48 = vand.u32 2147483648, %v984_v52  ;;  %vm993_vm0 = vweird.f32 %v984_v52  ;;  %v997_v31 = vand.u32 2147483647, %v984_v52 }
 0x67d   :  { %524 = vrot.lane.b32.xlu1 %v519_v53, %s1441_s12 }
 0x67e   :  { %v1000_v61 = vor.u32 1.1754944e-38, %v999_v48  ;;  %vm998_vm3 = vcmp.eq.f32.partialorder %v997_v31, 8.507059e+37 }
 0x682   :  { %v1318_v55 = vpop.eup %1317 }
 0x683   :  { %v989_v45 = vmul.f32 %v1318_v55, %v984_v52  ;;  %v987_v11 = vpop.xlane.xlu0 %986  ;;  %vm994_vm15 = vweird.f32 %v1318_v55 }
 0x684   :  { %1319 = vrcp.f32 %v987_v11  ;;  %v521_v24 = vpop.f32.mrf.mxu3  ;;  %vm995_vm1 = vmor %vm993_vm0, %vm994_vm15  ;;  %v1014_v57 = vand.u32 2147483648, %v987_v11  ;;  %v1012_v59 = vand.u32 2147483647, %v987_v11  ;;  %vm1008_vm4 = vweird.f32 %v987_v11 }
 0x685   :  { %v990_v34 = vsub.f32 1.0, %v989_v45 }
 0x686   :  { %v1015_v2 = vor.u32 1.1754944e-38, %v1014_v57  ;;  %vm1013_vm6 = vcmp.eq.f32.partialorder %v1012_v59, 8.507059e+37 }
 0x687   :  { %v991_v35 = vmul.f32 %v1318_v55, %v990_v34 }
 0x689   :  { %v992_v56 = vadd.f32 %v1318_v55, %v991_v35 }
 0x68a   :  { %v1320_v22 = vpop.eup %1319 }
 0x68b   :  { %v1004_v54 = vmul.f32 %v1320_v22, %v987_v11  ;;  %vm1009_vm2 = vweird.f32 %v1320_v22  ;;  %v996_v60 = vsel %vm995_vm1, %v1318_v55, %v992_v56 }
 0x68c   :  { %vm1010_vm5 = vmor %vm1008_vm4, %vm1009_vm2  ;;  %v1001_v3 = vsel %vm998_vm3, %v1000_v61, %v996_v60 }
 0x68d   :  { %v1005_v13 = vsub.f32 1.0, %v1004_v54  ;;  %v1002_v7 = vmul.f32 %v1745_v12, %v1001_v3 }
 0x68f   :  { %v1006_v58 = vmul.f32 %v1320_v22, %v1005_v13 }
 0x691   :  { %v1007_v62 = vadd.f32 %v1320_v22, %v1006_v58 }
 0x693   :  { %v1011_v4 = vsel %vm1010_vm5, %v1320_v22, %v1007_v62 }
 0x694   :  { %v1016_v6 = vsel %vm1013_vm6, %v1015_v2, %v1011_v4 }
 0x695   :  { %v1017_v8 = vmul.f32 %v1750_v19, %v1016_v6 }
 0x697   :  { %v1018_v9 = vpack.c.bf16 %v1017_v8, %v1002_v7 }
 0x699   :  { %v1042_v14 = vsel %vm201_vm9, %v1018_v9, 0 }
 0x69a   :  { %1051 = vmatpush.bf16.xpose.msrb.mxu3 %v1042_v14 }
 0x6c8   :  { %v1030_v17 = vpop.trf.xlu1 }
 0x6d2   :  { %v801_v16 = vpop.trf.xlu2 }
 0x6d3   :  { %1217 = vmatmul.msk.bf16.vlgmr.msra.gmra.mxu3 %vm201_vm9, %v801_v16 }
 0x6e2   :  { %v1146_v12 = vpop.trf.xlu2 }
 0x6e3   :  { %1221 = vmatmul.msk.bf16.vlgmr.msrb.gmra.mxu3 %vm201_vm9, %v1030_v17 }
 0x6e5   :  { %v914_v18 = vpop.trf.xlu0 }
 0x6e6   :  { %1219 = vmatmul.msk.bf16.vlgmr.msrb.gmra.mxu1 %vm201_vm9, %v914_v18 }
 0x6ef   :  { %v525_v20 = vpop.permute.xlu1 %524 }
 0x6f0   :  { %528 = vst.msk [vmem:[#allocation8] sm:$0xff] %vm527_vm7, %v525_v20 }
 0x6f1   :  { %645 = vst.msk [vmem:[#allocation8] sm:$0xff] %vm644_vm8, %v1684_v5 }
 0x6f6   :  { %1223 = vmatmul.msk.bf16.vlgmr.msra.gmra.mxu1 %vm201_vm9, %v1146_v12 }
 0x756   :  { %v824_v19 = vpop.f32.mrf.mxu3 }
 0x757   :  { %829 = vst.msk [vmem:[#allocation8 + $0x8] sm:$0xff] %vm201_vm9, %v824_v19 }
 0x75e   :  { %v826_v23 = vpop.f32.mrf.mxu3 }
 0x763   :  { %v937_v46 = vpop.f32.mrf.mxu1 }
 0x764   :  { %942 = vrot.lane.b32.xlu0 %v937_v46, %s1440_s11 }
 0x766   :  { %v1053_v47 = vpop.f32.mrf.mxu3 }
 0x767   :  { %1058 = vrot.lane.b32.xlu2 %v1053_v47, %s1441_s12 }
 0x76b   :  { %v939_v0 = vpop.f32.mrf.mxu1 }
 0x76e   :  { %v1055_v1 = vpop.f32.mrf.mxu3 }
 0x773   :  { %v1169_v10 = vpop.f32.mrf.mxu1 }
 0x774   :  { %1174 = vrot.lane.b32.xlu1 %v1169_v10, %s1438_s9 }
 0x77b   :  { %v1171_v25 = vpop.f32.mrf.mxu1 }
 0x7c1   :  { %v1059_v5 = vpop.permute.xlu2 %1058 }
 0x7d6   :  { %v943_v15 = vpop.permute.xlu0 %942 }
 0x7d7   :  { %945 = vst.msk [vmem:[#allocation8 + $0x8] sm:$0xff] %vm410_vm10, %v943_v15 }
 0x7d8   :  { %1061 = vst.msk [vmem:[#allocation8 + $0x8] sm:$0xff] %vm527_vm7, %v1059_v5 }
 0x7e6   :  { %v1175_v38 = vpop.permute.xlu1 %1174 }
 0x7e7   :  { %1177 = vst.msk [vmem:[#allocation8 + $0x8] sm:$0xff] %vm644_vm8, %v1175_v38 }
 0x7e8   :  { %1190 = dma.vmem_to_hbm [thread:$0]  %s1183_s14, 256, %s1185_s17, [#allocation4], %s1424_s20, %s1424_s20, %s1425_s21  }
 0x7e9   :  { %1421 = dma.done.wait [#allocation4], 256  }
 0x7ea   :  { %1422 = vsyncadd [#allocation4], 4294967040 }
 0x7eb   :  { %1195 = vsyncpa [#allocation3], 1 }
 0x7ec   :  { %1196 = vsyncpa [#allocation6], 1 }
 0x7ed   :  { %1197 = vsyncpa [#allocation4], 1 }

</bundles_post_ra>
